<compile_context>
chip_gen: v5e
topology: v5e:2x2
jax: 0.10.0
libtpu: 0.0.40
codegen_flags: <defaults>
</compile_context>

<pallas_src>
import functools

import jax
import jax.numpy as jnp
from jax import lax
from jax.experimental import pallas as pl
from jax.experimental.pallas import tpu as pltpu


# ----------------------------------------------------------------------------
# Fused all-layers decoder kernel: grid=(num_layers,), carried tgt in VMEM scratch
# ----------------------------------------------------------------------------

# Packed bias / LayerNorm slab row indices (width D each):
#   0..2  : self-attn  q / k / v biases (q row pre-scaled by 1/sqrt(Dh))
#   3     : self-attn  out-proj bias
#   4..6  : cross-attn q / k / v biases (q row pre-scaled)
#   7     : cross-attn out-proj bias
#   8     : FFN second bias (b2)
#   9,10  : norm1 gamma / beta
#   11,12 : norm2 gamma / beta
#   13,14 : norm3 gamma / beta
#   15,16 : final decoder norm gamma / beta
_BLN_ROWS = 17


def _fused_decoder_kernel(tq_ref, kv_ref, wblob_ref, w2_ref, bln_ref, b1_ref,
                          out_ref, carry_ref, *, nhead):
    f32 = jnp.float32
    layer = pl.program_id(0)

    _, B, Lq, D = tq_ref.shape           # tq_ref: (2, B, Lq, D) = [tgt, query_pos]
    Lk = kv_ref.shape[2]                 # kv_ref: (2, B, Lk, D) = [memory, memory+pos]
    F = b1_ref.shape[-1]
    Dh = D // nhead
    Mq, Mk = B * Lq, B * Lk

    # Initialize the carried activation (VMEM-resident across all layers) at layer 0.
    @pl.when(layer == 0)
    def _init():
        carry_ref[...] = tq_ref[0]

    tgt = carry_ref[...].reshape(Mq, D)      # carried decoder state, (B*Lq, D)
    qpos = tq_ref[1].reshape(Mq, D)
    mem = kv_ref[0].reshape(Mk, D)           # memory           (value input)
    memk = kv_ref[1].reshape(Mk, D)          # memory + pos     (key input)

    # --- this layer's weights (static slices of the packed blob: zero-cost views) ---
    wblob = wblob_ref[0]                     # (D, 8D + F)
    w_sa_in = wblob[:, 0:3 * D]              # (D, 3D)  Q cols pre-scaled by 1/sqrt(Dh)
    w_sa_out = wblob[:, 3 * D:4 * D]         # (D, D)
    w_ca_in = wblob[:, 4 * D:7 * D]          # (D, 3D)
    w_ca_out = wblob[:, 7 * D:8 * D]         # (D, D)
    w1 = wblob[:, 8 * D:]                    # (D, F)
    w2 = w2_ref[0]                           # (F, D)
    bln = bln_ref[0]                         # (17, D)
    b1 = b1_ref[0]                           # (1, F)

    def layer_norm(x, g, b):
        mean = jnp.mean(x, axis=-1, keepdims=True)
        c = x - mean
        var = jnp.mean(c * c, axis=-1, keepdims=True)
        return c * lax.rsqrt(var + 1e-5) * g + b

    def split_heads(x2d, L):
        # (B*L, D) -> (B*nhead, L, Dh); lane slices + major-axis stack only.
        return jnp.stack([x2d[b * L:(b + 1) * L, h * Dh:(h + 1) * Dh]
                          for b in range(B) for h in range(nhead)])

    def merge_heads(o):
        # (B*nhead, Lq, Dh) -> (B*Lq, D)
        return jnp.concatenate(
            [jnp.concatenate([o[b * nhead + h] for h in range(nhead)], axis=-1)
             for b in range(B)], axis=0)

    def mha(q2, k2, v2, Lkv, ow, ob):
        # q2: (B*Lq, D), k2/v2: (B*Lkv, D).  Heads + batch processed as one batched
        # dot_general pair, then a single full-width out-projection matmul (K=D).
        qh = split_heads(q2, Lq)
        kh = split_heads(k2, Lkv)
        vh = split_heads(v2, Lkv)
        s = jnp.einsum('hqd,hkd->hqk', qh, kh, preferred_element_type=f32)
        s = s - jnp.max(s, axis=-1, keepdims=True)
        p = jnp.exp(s)
        p = p * pl.reciprocal(jnp.sum(p, axis=-1, keepdims=True), approx=True)
        o = jnp.einsum('hqk,hkd->hqd', p, vh, preferred_element_type=f32)
        return jnp.dot(merge_heads(o), ow, preferred_element_type=f32) + ob

    # ---- self attention (q = k = tgt + query_pos, v = tgt) ----
    qk_in = tgt + qpos
    qk = jnp.dot(qk_in, w_sa_in[:, :2 * D], preferred_element_type=f32)
    q = qk[:, :D] + bln[0:1]
    k = qk[:, D:] + bln[1:2]
    v = jnp.dot(tgt, w_sa_in[:, 2 * D:], preferred_element_type=f32) + bln[2:3]
    attn = mha(q, k, v, Lq, w_sa_out, bln[3:4])
    x1 = layer_norm(tgt + attn, bln[9:10], bln[10:11])

    # ---- cross attention (q = x1 + query_pos, k = memory + pos, v = memory) ----
    q = jnp.dot(x1 + qpos, w_ca_in[:, :D], preferred_element_type=f32) + bln[4:5]
    k = jnp.dot(memk, w_ca_in[:, D:2 * D], preferred_element_type=f32) + bln[5:6]
    v = jnp.dot(mem, w_ca_in[:, 2 * D:], preferred_element_type=f32) + bln[6:7]
    attn = mha(q, k, v, Lk, w_ca_out, bln[7:8])
    x2 = layer_norm(x1 + attn, bln[11:12], bln[12:13])

    # ---- feed forward ----
    hid = jnp.maximum(jnp.dot(x2, w1, preferred_element_type=f32) + b1, 0.0)
    ff = jnp.dot(hid, w2, preferred_element_type=f32) + bln[8:9]
    x3 = layer_norm(x2 + ff, bln[13:14], bln[14:15])

    # carry un-normed state to the next layer; emit final_norm(x3) as this layer's
    # intermediate (last layer's slice == final decoder output after self.norm).
    carry_ref[...] = x3.reshape(B, Lq, D)
    out_ref[0] = layer_norm(x3, bln[15:16], bln[16:17]).reshape(B, Lq, D)


# ----------------------------------------------------------------------------
# Decoder forward (single pallas_call for the whole stack)
# ----------------------------------------------------------------------------

def transformer_decoder_fwd(tgt, memory, pos, query_pos, params, nhead,
                            return_intermediate=True):
    """Inputs in torch MHA convention (L, B, D). Returns (num_layers, Lq, B, D)."""
    Lq, B, D = tgt.shape
    Lk = memory.shape[0]
    nl = params["wblob"].shape[0]
    F = params["b1"].shape[-1]

    # batch-major activation slabs, packed to cut operand count:
    #   tq = [tgt, query_pos], kv = [memory, memory + pos]   (layer-invariant)
    tq = jnp.stack([jnp.transpose(tgt, (1, 0, 2)),
                    jnp.transpose(query_pos, (1, 0, 2))])          # (2, B, Lq, D)
    kv = jnp.stack([jnp.transpose(memory, (1, 0, 2)),
                    jnp.transpose(memory + pos, (1, 0, 2))])       # (2, B, Lk, D)

    kernel = functools.partial(_fused_decoder_kernel, nhead=nhead)
    out = pl.pallas_call(
        kernel,
        grid=(nl,),
        out_shape=jax.ShapeDtypeStruct((nl, B, Lq, D), jnp.float32),
        in_specs=[
            # layer-invariant activations (constant block index -> stay resident)
            pl.BlockSpec((2, B, Lq, D), lambda l: (0, 0, 0, 0)),
            pl.BlockSpec((2, B, Lk, D), lambda l: (0, 0, 0, 0)),
            # per-layer weights streamed along the layer grid axis (auto double-buffered)
            pl.BlockSpec((1, D, 8 * D + F), lambda l: (l, 0, 0)),
            pl.BlockSpec((1, F, D), lambda l: (l, 0, 0)),
            pl.BlockSpec((1, _BLN_ROWS, D), lambda l: (l, 0, 0)),
            pl.BlockSpec((1, 1, F), lambda l: (l, 0, 0)),
        ],
        out_specs=pl.BlockSpec((1, B, Lq, D), lambda l: (l, 0, 0, 0)),
        scratch_shapes=[pltpu.VMEM((B, Lq, D), jnp.float32)],       # carried tgt
        compiler_params=pltpu.CompilerParams(
            dimension_semantics=("arbitrary",)),                     # layers are sequential
    )(tq, kv, params["wblob"], params["w2s"], params["bln"], params["b1"])

    out_lqbd = jnp.transpose(out, (0, 2, 1, 3))                      # (nl, Lq, B, D)
    if return_intermediate:
        return out_lqbd
    return out_lqbd[-1]                                              # norm(final output)


# ----------------------------------------------------------------------------
# Deterministic parameter construction (stacked / packed for the fused kernel)
# ----------------------------------------------------------------------------

def _make_attn_blocks(key, d_model, nhead):
    k_in, k_out = jax.random.split(key)
    std = 0.02
    in_w = std * jax.random.normal(k_in, (d_model, 3 * d_model), jnp.float32)
    out_w = std * jax.random.normal(k_out, (d_model, d_model), jnp.float32)
    # Fold the 1/sqrt(head_dim) attention scale into the Q projection (and its bias):
    # (x @ Wq + bq) * s == x @ (Wq*s) + bq*s  -> kernel never multiplies q by the scale.
    scale = float(d_model // nhead) ** -0.5
    col_scale = jnp.concatenate(
        [jnp.full((d_model,), scale, jnp.float32),
         jnp.ones((2 * d_model,), jnp.float32)])[None, :]
    in_b = jnp.zeros((3, d_model), jnp.float32)        # rows: q, k, v biases
    in_b = in_b.at[0].multiply(scale)                  # keep fold correct for nonzero bq
    out_b = jnp.zeros((1, d_model), jnp.float32)
    return in_w * col_scale, in_b, out_w, out_b


def make_decoder_params(key, num_layers, d_model, dim_ff, nhead):
    D, F = d_model, dim_ff
    ones = jnp.ones((1, D), jnp.float32)
    zeros = jnp.zeros((1, D), jnp.float32)
    std = 0.02
    wblobs, w2s, blns, b1s = [], [], [], []
    for k in jax.random.split(key, num_layers):
        k_sa, k_ca, k_w1, k_w2 = jax.random.split(k, 4)
        sa_w, sa_b, sa_ow, sa_ob = _make_attn_blocks(k_sa, D, nhead)
        ca_w, ca_b, ca_ow, ca_ob = _make_attn_blocks(k_ca, D, nhead)
        w1 = std * jax.random.normal(k_w1, (D, F), jnp.float32)
        w2 = std * jax.random.normal(k_w2, (F, D), jnp.float32)
        # one contiguous blob of all D-row weights per layer
        wblobs.append(jnp.concatenate([sa_w, sa_ow, ca_w, ca_ow, w1], axis=1))
        w2s.append(w2)
        blns.append(jnp.concatenate([
            sa_b, sa_ob,                 # rows 0..3
            ca_b, ca_ob,                 # rows 4..7
            zeros,                       # row  8 : FFN b2
            ones, zeros,                 # rows 9,10 : norm1
            ones, zeros,                 # rows 11,12: norm2
            ones, zeros,                 # rows 13,14: norm3
            ones, zeros,                 # rows 15,16: final decoder norm
        ], axis=0))
        b1s.append(jnp.zeros((1, F), jnp.float32))
    return {"wblob": jnp.stack(wblobs),          # (nl, D, 8D+F)
            "w2s": jnp.stack(w2s),               # (nl, F, D)
            "bln": jnp.stack(blns),              # (nl, 17, D)
            "b1": jnp.stack(b1s)}                # (nl, 1, F)


# ----------------------------------------------------------------------------
# Main
# ----------------------------------------------------------------------------

if __name__ == "__main__":
    d_model = 32
    nhead = 4
    num_layers = 2
    dim_ff = 64
    num_queries = 8     # tgt sequence length
    mem_len = 16        # memory sequence length (e.g. H*W of encoder features)
    batch = 2

    params = make_decoder_params(jax.random.PRNGKey(42), num_layers, d_model,
                                 dim_ff, nhead)

    k0, k1, k2, k3 = jax.random.split(jax.random.PRNGKey(0), 4)
    tgt = jax.random.normal(k0, (num_queries, batch, d_model), jnp.float32)
    memory = jax.random.normal(k1, (mem_len, batch, d_model), jnp.float32)
    pos = jax.random.normal(k2, (mem_len, batch, d_model), jnp.float32)
    query_pos = jax.random.normal(k3, (num_queries, batch, d_model), jnp.float32)

    fwd = jax.jit(functools.partial(transformer_decoder_fwd, nhead=nhead,
                                    return_intermediate=True))
    out = jax.block_until_ready(fwd(tgt, memory, pos, query_pos, params))

    assert out.shape == (num_layers, num_queries, batch, d_model)
    assert jnp.all(jnp.isfinite(out))
    print("KERNEL_OK")
</pallas_src>

<mosaic_0001>
module attributes {stable_mosaic.version = 11 : i64} {
  func.func @_fused_decoder_kernel(%arg0: i32, %arg1: memref<2x2x8x32xf32, #tpu.memory_space<vmem>>, %arg2: memref<2x2x16x32xf32, #tpu.memory_space<vmem>>, %arg3: memref<1x32x320xf32, #tpu.memory_space<vmem>>, %arg4: memref<1x64x32xf32, #tpu.memory_space<vmem>>, %arg5: memref<1x17x32xf32, #tpu.memory_space<vmem>>, %arg6: memref<1x1x64xf32, #tpu.memory_space<vmem>>, %arg7: memref<1x2x8x32xf32, #tpu.memory_space<vmem>>, %arg8: memref<2x8x32xf32, #tpu.memory_space<vmem>>) attributes {dimension_semantics = [#tpu.dimension_semantics<arbitrary>], iteration_bounds = array<i64: 2>, scalar_prefetch = 0 : i64, scratch_operands = 1 : i64, tpu.core_type = #tpu.core_type<tc>, window_params = [{pipeline_mode = #tpu.pipeline_mode<synchronous>, transform_indices = @transform_0, window_bounds = array<i64: 2, 2, 8, 32>}, {pipeline_mode = #tpu.pipeline_mode<synchronous>, transform_indices = @transform_1, window_bounds = array<i64: 2, 2, 16, 32>}, {transform_indices = @transform_2, window_bounds = array<i64: 1, 32, 320>}, {transform_indices = @transform_3, window_bounds = array<i64: 1, 64, 32>}, {transform_indices = @transform_4, window_bounds = array<i64: 1, 17, 32>}, {transform_indices = @transform_5, window_bounds = array<i64: 1, 1, 64>}, {transform_indices = @transform_6, window_bounds = array<i64: 1, 2, 8, 32>}]} {
    %c0_i32 = arith.constant 0 : i32
    %0 = arith.cmpi eq, %arg0, %c0_i32 : i32
    %1 = arith.extui %0 : i1 to i32
    %c0_i32_0 = arith.constant 0 : i32
    %2 = arith.cmpi ne, %1, %c0_i32_0 : i32
    scf.if %2 {
      %c0_70 = arith.constant 0 : index
      %c0_71 = arith.constant 0 : index
      %c0_72 = arith.constant 0 : index
      %c0_73 = arith.constant 0 : index
      %337 = vector.load %arg1[%c0_70, %c0_71, %c0_72, %c0_73] : memref<2x2x8x32xf32, #tpu.memory_space<vmem>>, vector<1x2x8x32xf32>
      %338 = vector.shape_cast %337 : vector<1x2x8x32xf32> to vector<2x8x32xf32>
      %c0_74 = arith.constant 0 : index
      %c0_75 = arith.constant 0 : index
      %c0_76 = arith.constant 0 : index
      %339 = vector.load %arg8[%c0_74, %c0_75, %c0_76] : memref<2x8x32xf32, #tpu.memory_space<vmem>>, vector<2x8x32xf32>
      tpu.vector_store %arg8[%c0_74, %c0_75, %c0_76], %338 {strides = array<i32>} : memref<2x8x32xf32, #tpu.memory_space<vmem>>, vector<2x8x32xf32>,
    } else {
    }
    %c0 = arith.constant 0 : index
    %c0_1 = arith.constant 0 : index
    %c0_2 = arith.constant 0 : index
    %3 = vector.load %arg8[%c0, %c0_1, %c0_2] : memref<2x8x32xf32, #tpu.memory_space<vmem>>, vector<2x8x32xf32>
    %4 = vector.shape_cast %3 : vector<2x8x32xf32> to vector<16x32xf32>
    %c1 = arith.constant 1 : index
    %c0_3 = arith.constant 0 : index
    %c0_4 = arith.constant 0 : index
    %c0_5 = arith.constant 0 : index
    %5 = vector.load %arg1[%c1, %c0_3, %c0_4, %c0_5] : memref<2x2x8x32xf32, #tpu.memory_space<vmem>>, vector<1x2x8x32xf32>
    %6 = vector.shape_cast %5 : vector<1x2x8x32xf32> to vector<2x8x32xf32>
    %7 = vector.shape_cast %6 : vector<2x8x32xf32> to vector<16x32xf32>
    %c0_6 = arith.constant 0 : index
    %c0_7 = arith.constant 0 : index
    %c0_8 = arith.constant 0 : index
    %c0_9 = arith.constant 0 : index
    %8 = vector.load %arg2[%c0_6, %c0_7, %c0_8, %c0_9] : memref<2x2x16x32xf32, #tpu.memory_space<vmem>>, vector<1x2x16x32xf32>
    %9 = vector.shape_cast %8 : vector<1x2x16x32xf32> to vector<2x16x32xf32>
    %10 = vector.shape_cast %9 : vector<2x16x32xf32> to vector<32x32xf32>
    %c1_10 = arith.constant 1 : index
    %c0_11 = arith.constant 0 : index
    %c0_12 = arith.constant 0 : index
    %c0_13 = arith.constant 0 : index
    %11 = vector.load %arg2[%c1_10, %c0_11, %c0_12, %c0_13] : memref<2x2x16x32xf32, #tpu.memory_space<vmem>>, vector<1x2x16x32xf32>
    %12 = vector.shape_cast %11 : vector<1x2x16x32xf32> to vector<2x16x32xf32>
    %13 = vector.shape_cast %12 : vector<2x16x32xf32> to vector<32x32xf32>
    %c0_14 = arith.constant 0 : index
    %c0_15 = arith.constant 0 : index
    %c0_16 = arith.constant 0 : index
    %14 = vector.load %arg3[%c0_14, %c0_15, %c0_16] : memref<1x32x320xf32, #tpu.memory_space<vmem>>, vector<1x32x320xf32>
    %15 = vector.shape_cast %14 : vector<1x32x320xf32> to vector<32x320xf32>
    %16 = vector.extract_strided_slice %15 {offsets = [0, 0], sizes = [32, 96], strides = [1, 1]} : vector<32x320xf32> to vector<32x96xf32>
    %17 = vector.extract_strided_slice %15 {offsets = [0, 96], sizes = [32, 32], strides = [1, 1]} : vector<32x320xf32> to vector<32x32xf32>
    %18 = vector.extract_strided_slice %15 {offsets = [0, 128], sizes = [32, 96], strides = [1, 1]} : vector<32x320xf32> to vector<32x96xf32>
    %19 = vector.extract_strided_slice %15 {offsets = [0, 224], sizes = [32, 32], strides = [1, 1]} : vector<32x320xf32> to vector<32x32xf32>
    %20 = vector.extract_strided_slice %15 {offsets = [0, 256], sizes = [32, 64], strides = [1, 1]} : vector<32x320xf32> to vector<32x64xf32>
    %c0_17 = arith.constant 0 : index
    %c0_18 = arith.constant 0 : index
    %c0_19 = arith.constant 0 : index
    %21 = vector.load %arg4[%c0_17, %c0_18, %c0_19] : memref<1x64x32xf32, #tpu.memory_space<vmem>>, vector<1x64x32xf32>
    %22 = vector.shape_cast %21 : vector<1x64x32xf32> to vector<64x32xf32>
    %c0_20 = arith.constant 0 : index
    %c0_21 = arith.constant 0 : index
    %c0_22 = arith.constant 0 : index
    %23 = vector.load %arg5[%c0_20, %c0_21, %c0_22] : memref<1x17x32xf32, #tpu.memory_space<vmem>>, vector<1x17x32xf32>
    %24 = vector.shape_cast %23 : vector<1x17x32xf32> to vector<17x32xf32>
    %c0_23 = arith.constant 0 : index
    %c0_24 = arith.constant 0 : index
    %c0_25 = arith.constant 0 : index
    %25 = vector.load %arg6[%c0_23, %c0_24, %c0_25] : memref<1x1x64xf32, #tpu.memory_space<vmem>>, vector<1x1x64xf32>
    %26 = vector.shape_cast %25 : vector<1x1x64xf32> to vector<1x64xf32>
    %27 = arith.addf %4, %7 : vector<16x32xf32>
    %28 = vector.extract_strided_slice %16 {offsets = [0, 0], sizes = [32, 64], strides = [1, 1]} : vector<32x96xf32> to vector<32x64xf32>
    %cst = arith.constant dense<0.000000e+00> : vector<16x64xf32>
    %29 = tpu.matmul %27, %28, %cst {dimension_numbers = #tpu.dot_dimension_numbers<[1], [0], [0], [1], [0, 0, 1, 1], [], []>} : vector<16x32xf32>, vector<32x64xf32>, vector<16x64xf32> -> vector<16x64xf32>
    %30 = vector.extract_strided_slice %29 {offsets = [0, 0], sizes = [16, 32], strides = [1, 1]} : vector<16x64xf32> to vector<16x32xf32>
    %31 = vector.extract_strided_slice %24 {offsets = [0, 0], sizes = [1, 32], strides = [1, 1]} : vector<17x32xf32> to vector<1x32xf32>
    %32 = vector.broadcast %31 : vector<1x32xf32> to vector<16x32xf32>
    %33 = arith.addf %30, %32 : vector<16x32xf32>
    %34 = vector.extract_strided_slice %29 {offsets = [0, 32], sizes = [16, 32], strides = [1, 1]} : vector<16x64xf32> to vector<16x32xf32>
    %35 = vector.extract_strided_slice %24 {offsets = [1, 0], sizes = [1, 32], strides = [1, 1]} : vector<17x32xf32> to vector<1x32xf32>
    %36 = vector.broadcast %35 : vector<1x32xf32> to vector<16x32xf32>
    %37 = arith.addf %34, %36 : vector<16x32xf32>
    %38 = vector.extract_strided_slice %16 {offsets = [0, 64], sizes = [32, 32], strides = [1, 1]} : vector<32x96xf32> to vector<32x32xf32>
    %cst_26 = arith.constant dense<0.000000e+00> : vector<16x32xf32>
    %39 = tpu.matmul %4, %38, %cst_26 {dimension_numbers = #tpu.dot_dimension_numbers<[1], [0], [0], [1], [0, 0, 1, 1], [], []>} : vector<16x32xf32>, vector<32x32xf32>, vector<16x32xf32> -> vector<16x32xf32>
    %40 = vector.extract_strided_slice %24 {offsets = [2, 0], sizes = [1, 32], strides = [1, 1]} : vector<17x32xf32> to vector<1x32xf32>
    %41 = vector.broadcast %40 : vector<1x32xf32> to vector<16x32xf32>
    %42 = arith.addf %39, %41 : vector<16x32xf32>
    %43 = vector.extract_strided_slice %24 {offsets = [3, 0], sizes = [1, 32], strides = [1, 1]} : vector<17x32xf32> to vector<1x32xf32>
    %44 = vector.extract_strided_slice %33 {offsets = [0, 0], sizes = [8, 8], strides = [1, 1]} : vector<16x32xf32> to vector<8x8xf32>
    %45 = vector.extract_strided_slice %33 {offsets = [0, 8], sizes = [8, 8], strides = [1, 1]} : vector<16x32xf32> to vector<8x8xf32>
    %46 = vector.extract_strided_slice %33 {offsets = [0, 16], sizes = [8, 8], strides = [1, 1]} : vector<16x32xf32> to vector<8x8xf32>
    %47 = vector.extract_strided_slice %33 {offsets = [0, 24], sizes = [8, 8], strides = [1, 1]} : vector<16x32xf32> to vector<8x8xf32>
    %48 = vector.extract_strided_slice %33 {offsets = [8, 0], sizes = [8, 8], strides = [1, 1]} : vector<16x32xf32> to vector<8x8xf32>
    %49 = vector.extract_strided_slice %33 {offsets = [8, 8], sizes = [8, 8], strides = [1, 1]} : vector<16x32xf32> to vector<8x8xf32>
    %50 = vector.extract_strided_slice %33 {offsets = [8, 16], sizes = [8, 8], strides = [1, 1]} : vector<16x32xf32> to vector<8x8xf32>
    %51 = vector.extract_strided_slice %33 {offsets = [8, 24], sizes = [8, 8], strides = [1, 1]} : vector<16x32xf32> to vector<8x8xf32>
    %52 = vector.shape_cast %44 : vector<8x8xf32> to vector<1x8x8xf32>
    %53 = vector.shape_cast %45 : vector<8x8xf32> to vector<1x8x8xf32>
    %54 = vector.shape_cast %46 : vector<8x8xf32> to vector<1x8x8xf32>
    %55 = vector.shape_cast %47 : vector<8x8xf32> to vector<1x8x8xf32>
    %56 = vector.shape_cast %48 : vector<8x8xf32> to vector<1x8x8xf32>
    %57 = vector.shape_cast %49 : vector<8x8xf32> to vector<1x8x8xf32>
    %58 = vector.shape_cast %50 : vector<8x8xf32> to vector<1x8x8xf32>
    %59 = vector.shape_cast %51 : vector<8x8xf32> to vector<1x8x8xf32>
    %60 = tpu.concatenate %52, %53, %54, %55, %56, %57, %58, %59 in 0 : vector<1x8x8xf32>, vector<1x8x8xf32>, vector<1x8x8xf32>, vector<1x8x8xf32>, vector<1x8x8xf32>, vector<1x8x8xf32>, vector<1x8x8xf32>, vector<1x8x8xf32> -> vector<8x8x8xf32>
    %61 = vector.extract_strided_slice %37 {offsets = [0, 0], sizes = [8, 8], strides = [1, 1]} : vector<16x32xf32> to vector<8x8xf32>
    %62 = vector.extract_strided_slice %37 {offsets = [0, 8], sizes = [8, 8], strides = [1, 1]} : vector<16x32xf32> to vector<8x8xf32>
    %63 = vector.extract_strided_slice %37 {offsets = [0, 16], sizes = [8, 8], strides = [1, 1]} : vector<16x32xf32> to vector<8x8xf32>
    %64 = vector.extract_strided_slice %37 {offsets = [0, 24], sizes = [8, 8], strides = [1, 1]} : vector<16x32xf32> to vector<8x8xf32>
    %65 = vector.extract_strided_slice %37 {offsets = [8, 0], sizes = [8, 8], strides = [1, 1]} : vector<16x32xf32> to vector<8x8xf32>
    %66 = vector.extract_strided_slice %37 {offsets = [8, 8], sizes = [8, 8], strides = [1, 1]} : vector<16x32xf32> to vector<8x8xf32>
    %67 = vector.extract_strided_slice %37 {offsets = [8, 16], sizes = [8, 8], strides = [1, 1]} : vector<16x32xf32> to vector<8x8xf32>
    %68 = vector.extract_strided_slice %37 {offsets = [8, 24], sizes = [8, 8], strides = [1, 1]} : vector<16x32xf32> to vector<8x8xf32>
    %69 = vector.shape_cast %61 : vector<8x8xf32> to vector<1x8x8xf32>
    %70 = vector.shape_cast %62 : vector<8x8xf32> to vector<1x8x8xf32>
    %71 = vector.shape_cast %63 : vector<8x8xf32> to vector<1x8x8xf32>
    %72 = vector.shape_cast %64 : vector<8x8xf32> to vector<1x8x8xf32>
    %73 = vector.shape_cast %65 : vector<8x8xf32> to vector<1x8x8xf32>
    %74 = vector.shape_cast %66 : vector<8x8xf32> to vector<1x8x8xf32>
    %75 = vector.shape_cast %67 : vector<8x8xf32> to vector<1x8x8xf32>
    %76 = vector.shape_cast %68 : vector<8x8xf32> to vector<1x8x8xf32>
    %77 = tpu.concatenate %69, %70, %71, %72, %73, %74, %75, %76 in 0 : vector<1x8x8xf32>, vector<1x8x8xf32>, vector<1x8x8xf32>, vector<1x8x8xf32>, vector<1x8x8xf32>, vector<1x8x8xf32>, vector<1x8x8xf32>, vector<1x8x8xf32> -> vector<8x8x8xf32>
    %78 = vector.extract_strided_slice %42 {offsets = [0, 0], sizes = [8, 8], strides = [1, 1]} : vector<16x32xf32> to vector<8x8xf32>
    %79 = vector.extract_strided_slice %42 {offsets = [0, 8], sizes = [8, 8], strides = [1, 1]} : vector<16x32xf32> to vector<8x8xf32>
    %80 = vector.extract_strided_slice %42 {offsets = [0, 16], sizes = [8, 8], strides = [1, 1]} : vector<16x32xf32> to vector<8x8xf32>
    %81 = vector.extract_strided_slice %42 {offsets = [0, 24], sizes = [8, 8], strides = [1, 1]} : vector<16x32xf32> to vector<8x8xf32>
    %82 = vector.extract_strided_slice %42 {offsets = [8, 0], sizes = [8, 8], strides = [1, 1]} : vector<16x32xf32> to vector<8x8xf32>
    %83 = vector.extract_strided_slice %42 {offsets = [8, 8], sizes = [8, 8], strides = [1, 1]} : vector<16x32xf32> to vector<8x8xf32>
    %84 = vector.extract_strided_slice %42 {offsets = [8, 16], sizes = [8, 8], strides = [1, 1]} : vector<16x32xf32> to vector<8x8xf32>
    %85 = vector.extract_strided_slice %42 {offsets = [8, 24], sizes = [8, 8], strides = [1, 1]} : vector<16x32xf32> to vector<8x8xf32>
    %86 = vector.shape_cast %78 : vector<8x8xf32> to vector<1x8x8xf32>
    %87 = vector.shape_cast %79 : vector<8x8xf32> to vector<1x8x8xf32>
    %88 = vector.shape_cast %80 : vector<8x8xf32> to vector<1x8x8xf32>
    %89 = vector.shape_cast %81 : vector<8x8xf32> to vector<1x8x8xf32>
    %90 = vector.shape_cast %82 : vector<8x8xf32> to vector<1x8x8xf32>
    %91 = vector.shape_cast %83 : vector<8x8xf32> to vector<1x8x8xf32>
    %92 = vector.shape_cast %84 : vector<8x8xf32> to vector<1x8x8xf32>
    %93 = vector.shape_cast %85 : vector<8x8xf32> to vector<1x8x8xf32>
    %94 = tpu.concatenate %86, %87, %88, %89, %90, %91, %92, %93 in 0 : vector<1x8x8xf32>, vector<1x8x8xf32>, vector<1x8x8xf32>, vector<1x8x8xf32>, vector<1x8x8xf32>, vector<1x8x8xf32>, vector<1x8x8xf32>, vector<1x8x8xf32> -> vector<8x8x8xf32>
    "tpu.trace_start"() <{level = 10 : i32, message = "hqd,hkd->hqk"}> : () -> ()
    %cst_27 = arith.constant dense<0.000000e+00> : vector<8x8x8xf32>
    %95 = tpu.matmul %60, %77, %cst_27 {dimension_numbers = #tpu.dot_dimension_numbers<[2], [2], [1], [1], [0, 0, 0, 1, 1, 1], [0], [0]>} : vector<8x8x8xf32>, vector<8x8x8xf32>, vector<8x8x8xf32> -> vector<8x8x8xf32>
    "tpu.trace_stop"() : () -> ()
    %cst_28 = arith.constant dense<0xFF800000> : vector<8x8xf32>
    %96 = vector.multi_reduction <maximumf>, %95, %cst_28 [2] : vector<8x8x8xf32> to vector<8x8xf32>
    %97 = vector.shape_cast %96 : vector<8x8xf32> to vector<8x8x1xf32>
    %98 = vector.broadcast %97 : vector<8x8x1xf32> to vector<8x8x8xf32>
    %99 = arith.subf %95, %98 : vector<8x8x8xf32>
    %100 = math.exp %99 : vector<8x8x8xf32>
    %cst_29 = arith.constant dense<0.000000e+00> : vector<8x8xf32>
    %101 = vector.multi_reduction <add>, %100, %cst_29 [2] : vector<8x8x8xf32> to vector<8x8xf32>
    %102 = vector.shape_cast %101 : vector<8x8xf32> to vector<8x8x1xf32>
    %103 = tpu.reciprocal %102 {approx = true} : vector<8x8x1xf32> -> vector<8x8x1xf32>
    %104 = vector.broadcast %103 : vector<8x8x1xf32> to vector<8x8x8xf32>
    %105 = arith.mulf %100, %104 : vector<8x8x8xf32>
    "tpu.trace_start"() <{level = 10 : i32, message = "hqk,hkd->hqd"}> : () -> ()
    %cst_30 = arith.constant dense<0.000000e+00> : vector<8x8x8xf32>
    %106 = tpu.matmul %105, %94, %cst_30 {dimension_numbers = #tpu.dot_dimension_numbers<[2], [1], [1], [2], [0, 0, 0, 1, 1, 2], [0], [0]>} : vector<8x8x8xf32>, vector<8x8x8xf32>, vector<8x8x8xf32> -> vector<8x8x8xf32>
    "tpu.trace_stop"() : () -> ()
    %107 = vector.extract_strided_slice %106 {offsets = [0, 0, 0], sizes = [1, 8, 8], strides = [1, 1, 1]} : vector<8x8x8xf32> to vector<1x8x8xf32>
    %108 = vector.shape_cast %107 : vector<1x8x8xf32> to vector<8x8xf32>
    %109 = vector.extract_strided_slice %106 {offsets = [1, 0, 0], sizes = [1, 8, 8], strides = [1, 1, 1]} : vector<8x8x8xf32> to vector<1x8x8xf32>
    %110 = vector.shape_cast %109 : vector<1x8x8xf32> to vector<8x8xf32>
    %111 = vector.extract_strided_slice %106 {offsets = [2, 0, 0], sizes = [1, 8, 8], strides = [1, 1, 1]} : vector<8x8x8xf32> to vector<1x8x8xf32>
    %112 = vector.shape_cast %111 : vector<1x8x8xf32> to vector<8x8xf32>
    %113 = vector.extract_strided_slice %106 {offsets = [3, 0, 0], sizes = [1, 8, 8], strides = [1, 1, 1]} : vector<8x8x8xf32> to vector<1x8x8xf32>
    %114 = vector.shape_cast %113 : vector<1x8x8xf32> to vector<8x8xf32>
    %115 = tpu.concatenate %108, %110, %112, %114 in 1 : vector<8x8xf32>, vector<8x8xf32>, vector<8x8xf32>, vector<8x8xf32> -> vector<8x32xf32>
    %116 = vector.extract_strided_slice %106 {offsets = [4, 0, 0], sizes = [1, 8, 8], strides = [1, 1, 1]} : vector<8x8x8xf32> to vector<1x8x8xf32>
    %117 = vector.shape_cast %116 : vector<1x8x8xf32> to vector<8x8xf32>
    %118 = vector.extract_strided_slice %106 {offsets = [5, 0, 0], sizes = [1, 8, 8], strides = [1, 1, 1]} : vector<8x8x8xf32> to vector<1x8x8xf32>
    %119 = vector.shape_cast %118 : vector<1x8x8xf32> to vector<8x8xf32>
    %120 = vector.extract_strided_slice %106 {offsets = [6, 0, 0], sizes = [1, 8, 8], strides = [1, 1, 1]} : vector<8x8x8xf32> to vector<1x8x8xf32>
    %121 = vector.shape_cast %120 : vector<1x8x8xf32> to vector<8x8xf32>
    %122 = vector.extract_strided_slice %106 {offsets = [7, 0, 0], sizes = [1, 8, 8], strides = [1, 1, 1]} : vector<8x8x8xf32> to vector<1x8x8xf32>
    %123 = vector.shape_cast %122 : vector<1x8x8xf32> to vector<8x8xf32>
    %124 = tpu.concatenate %117, %119, %121, %123 in 1 : vector<8x8xf32>, vector<8x8xf32>, vector<8x8xf32>, vector<8x8xf32> -> vector<8x32xf32>
    %125 = tpu.concatenate %115, %124 in 0 : vector<8x32xf32>, vector<8x32xf32> -> vector<16x32xf32>
    %cst_31 = arith.constant dense<0.000000e+00> : vector<16x32xf32>
    %126 = tpu.matmul %125, %17, %cst_31 {dimension_numbers = #tpu.dot_dimension_numbers<[1], [0], [0], [1], [0, 0, 1, 1], [], []>} : vector<16x32xf32>, vector<32x32xf32>, vector<16x32xf32> -> vector<16x32xf32>
    %127 = vector.broadcast %43 : vector<1x32xf32> to vector<16x32xf32>
    %128 = arith.addf %126, %127 : vector<16x32xf32>
    %129 = arith.addf %4, %128 : vector<16x32xf32>
    %130 = vector.extract_strided_slice %24 {offsets = [9, 0], sizes = [1, 32], strides = [1, 1]} : vector<17x32xf32> to vector<1x32xf32>
    %131 = vector.extract_strided_slice %24 {offsets = [10, 0], sizes = [1, 32], strides = [1, 1]} : vector<17x32xf32> to vector<1x32xf32>
    %cst_32 = arith.constant dense<0.000000e+00> : vector<16xf32>
    %132 = vector.multi_reduction <add>, %129, %cst_32 [1] : vector<16x32xf32> to vector<16xf32>
    %133 = vector.shape_cast %132 : vector<16xf32> to vector<16x1xf32>
    %cst_33 = arith.constant 3.200000e+01 : f32
    %134 = vector.broadcast %cst_33 : f32 to vector<16x1xf32>
    %135 = arith.divf %133, %134 : vector<16x1xf32>
    %136 = vector.broadcast %135 : vector<16x1xf32> to vector<16x32xf32>
    %137 = arith.subf %129, %136 : vector<16x32xf32>
    %138 = arith.mulf %137, %137 : vector<16x32xf32>
    %cst_34 = arith.constant dense<0.000000e+00> : vector<16xf32>
    %139 = vector.multi_reduction <add>, %138, %cst_34 [1] : vector<16x32xf32> to vector<16xf32>
    %140 = vector.shape_cast %139 : vector<16xf32> to vector<16x1xf32>
    %cst_35 = arith.constant 3.200000e+01 : f32
    %141 = vector.broadcast %cst_35 : f32 to vector<16x1xf32>
    %142 = arith.divf %140, %141 : vector<16x1xf32>
    %cst_36 = arith.constant 9.99999974E-6 : f32
    %143 = vector.broadcast %cst_36 : f32 to vector<16x1xf32>
    %144 = arith.addf %142, %143 : vector<16x1xf32>
    %145 = math.rsqrt %144 : vector<16x1xf32>
    %146 = vector.broadcast %145 : vector<16x1xf32> to vector<16x32xf32>
    %147 = arith.mulf %137, %146 : vector<16x32xf32>
    %148 = vector.broadcast %130 : vector<1x32xf32> to vector<16x32xf32>
    %149 = arith.mulf %147, %148 : vector<16x32xf32>
    %150 = vector.broadcast %131 : vector<1x32xf32> to vector<16x32xf32>
    %151 = arith.addf %149, %150 : vector<16x32xf32>
    %152 = arith.addf %151, %7 : vector<16x32xf32>
    %153 = vector.extract_strided_slice %18 {offsets = [0, 0], sizes = [32, 32], strides = [1, 1]} : vector<32x96xf32> to vector<32x32xf32>
    %cst_37 = arith.constant dense<0.000000e+00> : vector<16x32xf32>
    %154 = tpu.matmul %152, %153, %cst_37 {dimension_numbers = #tpu.dot_dimension_numbers<[1], [0], [0], [1], [0, 0, 1, 1], [], []>} : vector<16x32xf32>, vector<32x32xf32>, vector<16x32xf32> -> vector<16x32xf32>
    %155 = vector.extract_strided_slice %24 {offsets = [4, 0], sizes = [1, 32], strides = [1, 1]} : vector<17x32xf32> to vector<1x32xf32>
    %156 = vector.broadcast %155 : vector<1x32xf32> to vector<16x32xf32>
    %157 = arith.addf %154, %156 : vector<16x32xf32>
    %158 = vector.extract_strided_slice %18 {offsets = [0, 32], sizes = [32, 32], strides = [1, 1]} : vector<32x96xf32> to vector<32x32xf32>
    %cst_38 = arith.constant dense<0.000000e+00> : vector<32x32xf32>
    %159 = tpu.matmul %13, %158, %cst_38 {dimension_numbers = #tpu.dot_dimension_numbers<[1], [0], [0], [1], [0, 0, 1, 1], [], []>} : vector<32x32xf32>, vector<32x32xf32>, vector<32x32xf32> -> vector<32x32xf32>
    %160 = vector.extract_strided_slice %24 {offsets = [5, 0], sizes = [1, 32], strides = [1, 1]} : vector<17x32xf32> to vector<1x32xf32>
    %161 = vector.broadcast %160 : vector<1x32xf32> to vector<32x32xf32>
    %162 = arith.addf %159, %161 : vector<32x32xf32>
    %163 = vector.extract_strided_slice %18 {offsets = [0, 64], sizes = [32, 32], strides = [1, 1]} : vector<32x96xf32> to vector<32x32xf32>
    %cst_39 = arith.constant dense<0.000000e+00> : vector<32x32xf32>
    %164 = tpu.matmul %10, %163, %cst_39 {dimension_numbers = #tpu.dot_dimension_numbers<[1], [0], [0], [1], [0, 0, 1, 1], [], []>} : vector<32x32xf32>, vector<32x32xf32>, vector<32x32xf32> -> vector<32x32xf32>
    %165 = vector.extract_strided_slice %24 {offsets = [6, 0], sizes = [1, 32], strides = [1, 1]} : vector<17x32xf32> to vector<1x32xf32>
    %166 = vector.broadcast %165 : vector<1x32xf32> to vector<32x32xf32>
    %167 = arith.addf %164, %166 : vector<32x32xf32>
    %168 = vector.extract_strided_slice %24 {offsets = [7, 0], sizes = [1, 32], strides = [1, 1]} : vector<17x32xf32> to vector<1x32xf32>
    %169 = vector.extract_strided_slice %157 {offsets = [0, 0], sizes = [8, 8], strides = [1, 1]} : vector<16x32xf32> to vector<8x8xf32>
    %170 = vector.extract_strided_slice %157 {offsets = [0, 8], sizes = [8, 8], strides = [1, 1]} : vector<16x32xf32> to vector<8x8xf32>
    %171 = vector.extract_strided_slice %157 {offsets = [0, 16], sizes = [8, 8], strides = [1, 1]} : vector<16x32xf32> to vector<8x8xf32>
    %172 = vector.extract_strided_slice %157 {offsets = [0, 24], sizes = [8, 8], strides = [1, 1]} : vector<16x32xf32> to vector<8x8xf32>
    %173 = vector.extract_strided_slice %157 {offsets = [8, 0], sizes = [8, 8], strides = [1, 1]} : vector<16x32xf32> to vector<8x8xf32>
    %174 = vector.extract_strided_slice %157 {offsets = [8, 8], sizes = [8, 8], strides = [1, 1]} : vector<16x32xf32> to vector<8x8xf32>
    %175 = vector.extract_strided_slice %157 {offsets = [8, 16], sizes = [8, 8], strides = [1, 1]} : vector<16x32xf32> to vector<8x8xf32>
    %176 = vector.extract_strided_slice %157 {offsets = [8, 24], sizes = [8, 8], strides = [1, 1]} : vector<16x32xf32> to vector<8x8xf32>
    %177 = vector.shape_cast %169 : vector<8x8xf32> to vector<1x8x8xf32>
    %178 = vector.shape_cast %170 : vector<8x8xf32> to vector<1x8x8xf32>
    %179 = vector.shape_cast %171 : vector<8x8xf32> to vector<1x8x8xf32>
    %180 = vector.shape_cast %172 : vector<8x8xf32> to vector<1x8x8xf32>
    %181 = vector.shape_cast %173 : vector<8x8xf32> to vector<1x8x8xf32>
    %182 = vector.shape_cast %174 : vector<8x8xf32> to vector<1x8x8xf32>
    %183 = vector.shape_cast %175 : vector<8x8xf32> to vector<1x8x8xf32>
    %184 = vector.shape_cast %176 : vector<8x8xf32> to vector<1x8x8xf32>
    %185 = tpu.concatenate %177, %178, %179, %180, %181, %182, %183, %184 in 0 : vector<1x8x8xf32>, vector<1x8x8xf32>, vector<1x8x8xf32>, vector<1x8x8xf32>, vector<1x8x8xf32>, vector<1x8x8xf32>, vector<1x8x8xf32>, vector<1x8x8xf32> -> vector<8x8x8xf32>
    %186 = vector.extract_strided_slice %162 {offsets = [0, 0], sizes = [16, 8], strides = [1, 1]} : vector<32x32xf32> to vector<16x8xf32>
    %187 = vector.extract_strided_slice %162 {offsets = [0, 8], sizes = [16, 8], strides = [1, 1]} : vector<32x32xf32> to vector<16x8xf32>
    %188 = vector.extract_strided_slice %162 {offsets = [0, 16], sizes = [16, 8], strides = [1, 1]} : vector<32x32xf32> to vector<16x8xf32>
    %189 = vector.extract_strided_slice %162 {offsets = [0, 24], sizes = [16, 8], strides = [1, 1]} : vector<32x32xf32> to vector<16x8xf32>
    %190 = vector.extract_strided_slice %162 {offsets = [16, 0], sizes = [16, 8], strides = [1, 1]} : vector<32x32xf32> to vector<16x8xf32>
    %191 = vector.extract_strided_slice %162 {offsets = [16, 8], sizes = [16, 8], strides = [1, 1]} : vector<32x32xf32> to vector<16x8xf32>
    %192 = vector.extract_strided_slice %162 {offsets = [16, 16], sizes = [16, 8], strides = [1, 1]} : vector<32x32xf32> to vector<16x8xf32>
    %193 = vector.extract_strided_slice %162 {offsets = [16, 24], sizes = [16, 8], strides = [1, 1]} : vector<32x32xf32> to vector<16x8xf32>
    %194 = vector.shape_cast %186 : vector<16x8xf32> to vector<1x16x8xf32>
    %195 = vector.shape_cast %187 : vector<16x8xf32> to vector<1x16x8xf32>
    %196 = vector.shape_cast %188 : vector<16x8xf32> to vector<1x16x8xf32>
    %197 = vector.shape_cast %189 : vector<16x8xf32> to vector<1x16x8xf32>
    %198 = vector.shape_cast %190 : vector<16x8xf32> to vector<1x16x8xf32>
    %199 = vector.shape_cast %191 : vector<16x8xf32> to vector<1x16x8xf32>
    %200 = vector.shape_cast %192 : vector<16x8xf32> to vector<1x16x8xf32>
    %201 = vector.shape_cast %193 : vector<16x8xf32> to vector<1x16x8xf32>
    %202 = tpu.concatenate %194, %195, %196, %197, %198, %199, %200, %201 in 0 : vector<1x16x8xf32>, vector<1x16x8xf32>, vector<1x16x8xf32>, vector<1x16x8xf32>, vector<1x16x8xf32>, vector<1x16x8xf32>, vector<1x16x8xf32>, vector<1x16x8xf32> -> vector<8x16x8xf32>
    %203 = vector.extract_strided_slice %167 {offsets = [0, 0], sizes = [16, 8], strides = [1, 1]} : vector<32x32xf32> to vector<16x8xf32>
    %204 = vector.extract_strided_slice %167 {offsets = [0, 8], sizes = [16, 8], strides = [1, 1]} : vector<32x32xf32> to vector<16x8xf32>
    %205 = vector.extract_strided_slice %167 {offsets = [0, 16], sizes = [16, 8], strides = [1, 1]} : vector<32x32xf32> to vector<16x8xf32>
    %206 = vector.extract_strided_slice %167 {offsets = [0, 24], sizes = [16, 8], strides = [1, 1]} : vector<32x32xf32> to vector<16x8xf32>
    %207 = vector.extract_strided_slice %167 {offsets = [16, 0], sizes = [16, 8], strides = [1, 1]} : vector<32x32xf32> to vector<16x8xf32>
    %208 = vector.extract_strided_slice %167 {offsets = [16, 8], sizes = [16, 8], strides = [1, 1]} : vector<32x32xf32> to vector<16x8xf32>
    %209 = vector.extract_strided_slice %167 {offsets = [16, 16], sizes = [16, 8], strides = [1, 1]} : vector<32x32xf32> to vector<16x8xf32>
    %210 = vector.extract_strided_slice %167 {offsets = [16, 24], sizes = [16, 8], strides = [1, 1]} : vector<32x32xf32> to vector<16x8xf32>
    %211 = vector.shape_cast %203 : vector<16x8xf32> to vector<1x16x8xf32>
    %212 = vector.shape_cast %204 : vector<16x8xf32> to vector<1x16x8xf32>
    %213 = vector.shape_cast %205 : vector<16x8xf32> to vector<1x16x8xf32>
    %214 = vector.shape_cast %206 : vector<16x8xf32> to vector<1x16x8xf32>
    %215 = vector.shape_cast %207 : vector<16x8xf32> to vector<1x16x8xf32>
    %216 = vector.shape_cast %208 : vector<16x8xf32> to vector<1x16x8xf32>
    %217 = vector.shape_cast %209 : vector<16x8xf32> to vector<1x16x8xf32>
    %218 = vector.shape_cast %210 : vector<16x8xf32> to vector<1x16x8xf32>
    %219 = tpu.concatenate %211, %212, %213, %214, %215, %216, %217, %218 in 0 : vector<1x16x8xf32>, vector<1x16x8xf32>, vector<1x16x8xf32>, vector<1x16x8xf32>, vector<1x16x8xf32>, vector<1x16x8xf32>, vector<1x16x8xf32>, vector<1x16x8xf32> -> vector<8x16x8xf32>
    "tpu.trace_start"() <{level = 10 : i32, message = "hqd,hkd->hqk"}> : () -> ()
    %cst_40 = arith.constant dense<0.000000e+00> : vector<8x8x16xf32>
    %220 = tpu.matmul %185, %202, %cst_40 {dimension_numbers = #tpu.dot_dimension_numbers<[2], [2], [1], [1], [0, 0, 0, 1, 1, 1], [0], [0]>} : vector<8x8x8xf32>, vector<8x16x8xf32>, vector<8x8x16xf32> -> vector<8x8x16xf32>
    "tpu.trace_stop"() : () -> ()
    %cst_41 = arith.constant dense<0xFF800000> : vector<8x8xf32>
    %221 = vector.multi_reduction <maximumf>, %220, %cst_41 [2] : vector<8x8x16xf32> to vector<8x8xf32>
    %222 = vector.shape_cast %221 : vector<8x8xf32> to vector<8x8x1xf32>
    %223 = vector.broadcast %222 : vector<8x8x1xf32> to vector<8x8x16xf32>
    %224 = arith.subf %220, %223 : vector<8x8x16xf32>
    %225 = math.exp %224 : vector<8x8x16xf32>
    %cst_42 = arith.constant dense<0.000000e+00> : vector<8x8xf32>
    %226 = vector.multi_reduction <add>, %225, %cst_42 [2] : vector<8x8x16xf32> to vector<8x8xf32>
    %227 = vector.shape_cast %226 : vector<8x8xf32> to vector<8x8x1xf32>
    %228 = tpu.reciprocal %227 {approx = true} : vector<8x8x1xf32> -> vector<8x8x1xf32>
    %229 = vector.broadcast %228 : vector<8x8x1xf32> to vector<8x8x16xf32>
    %230 = arith.mulf %225, %229 : vector<8x8x16xf32>
    "tpu.trace_start"() <{level = 10 : i32, message = "hqk,hkd->hqd"}> : () -> ()
    %cst_43 = arith.constant dense<0.000000e+00> : vector<8x8x8xf32>
    %231 = tpu.matmul %230, %219, %cst_43 {dimension_numbers = #tpu.dot_dimension_numbers<[2], [1], [1], [2], [0, 0, 0, 1, 1, 2], [0], [0]>} : vector<8x8x16xf32>, vector<8x16x8xf32>, vector<8x8x8xf32> -> vector<8x8x8xf32>
    "tpu.trace_stop"() : () -> ()
    %232 = vector.extract_strided_slice %231 {offsets = [0, 0, 0], sizes = [1, 8, 8], strides = [1, 1, 1]} : vector<8x8x8xf32> to vector<1x8x8xf32>
    %233 = vector.shape_cast %232 : vector<1x8x8xf32> to vector<8x8xf32>
    %234 = vector.extract_strided_slice %231 {offsets = [1, 0, 0], sizes = [1, 8, 8], strides = [1, 1, 1]} : vector<8x8x8xf32> to vector<1x8x8xf32>
    %235 = vector.shape_cast %234 : vector<1x8x8xf32> to vector<8x8xf32>
    %236 = vector.extract_strided_slice %231 {offsets = [2, 0, 0], sizes = [1, 8, 8], strides = [1, 1, 1]} : vector<8x8x8xf32> to vector<1x8x8xf32>
    %237 = vector.shape_cast %236 : vector<1x8x8xf32> to vector<8x8xf32>
    %238 = vector.extract_strided_slice %231 {offsets = [3, 0, 0], sizes = [1, 8, 8], strides = [1, 1, 1]} : vector<8x8x8xf32> to vector<1x8x8xf32>
    %239 = vector.shape_cast %238 : vector<1x8x8xf32> to vector<8x8xf32>
    %240 = tpu.concatenate %233, %235, %237, %239 in 1 : vector<8x8xf32>, vector<8x8xf32>, vector<8x8xf32>, vector<8x8xf32> -> vector<8x32xf32>
    %241 = vector.extract_strided_slice %231 {offsets = [4, 0, 0], sizes = [1, 8, 8], strides = [1, 1, 1]} : vector<8x8x8xf32> to vector<1x8x8xf32>
    %242 = vector.shape_cast %241 : vector<1x8x8xf32> to vector<8x8xf32>
    %243 = vector.extract_strided_slice %231 {offsets = [5, 0, 0], sizes = [1, 8, 8], strides = [1, 1, 1]} : vector<8x8x8xf32> to vector<1x8x8xf32>
    %244 = vector.shape_cast %243 : vector<1x8x8xf32> to vector<8x8xf32>
    %245 = vector.extract_strided_slice %231 {offsets = [6, 0, 0], sizes = [1, 8, 8], strides = [1, 1, 1]} : vector<8x8x8xf32> to vector<1x8x8xf32>
    %246 = vector.shape_cast %245 : vector<1x8x8xf32> to vector<8x8xf32>
    %247 = vector.extract_strided_slice %231 {offsets = [7, 0, 0], sizes = [1, 8, 8], strides = [1, 1, 1]} : vector<8x8x8xf32> to vector<1x8x8xf32>
    %248 = vector.shape_cast %247 : vector<1x8x8xf32> to vector<8x8xf32>
    %249 = tpu.concatenate %242, %244, %246, %248 in 1 : vector<8x8xf32>, vector<8x8xf32>, vector<8x8xf32>, vector<8x8xf32> -> vector<8x32xf32>
    %250 = tpu.concatenate %240, %249 in 0 : vector<8x32xf32>, vector<8x32xf32> -> vector<16x32xf32>
    %cst_44 = arith.constant dense<0.000000e+00> : vector<16x32xf32>
    %251 = tpu.matmul %250, %19, %cst_44 {dimension_numbers = #tpu.dot_dimension_numbers<[1], [0], [0], [1], [0, 0, 1, 1], [], []>} : vector<16x32xf32>, vector<32x32xf32>, vector<16x32xf32> -> vector<16x32xf32>
    %252 = vector.broadcast %168 : vector<1x32xf32> to vector<16x32xf32>
    %253 = arith.addf %251, %252 : vector<16x32xf32>
    %254 = arith.addf %151, %253 : vector<16x32xf32>
    %255 = vector.extract_strided_slice %24 {offsets = [11, 0], sizes = [1, 32], strides = [1, 1]} : vector<17x32xf32> to vector<1x32xf32>
    %256 = vector.extract_strided_slice %24 {offsets = [12, 0], sizes = [1, 32], strides = [1, 1]} : vector<17x32xf32> to vector<1x32xf32>
    %cst_45 = arith.constant dense<0.000000e+00> : vector<16xf32>
    %257 = vector.multi_reduction <add>, %254, %cst_45 [1] : vector<16x32xf32> to vector<16xf32>
    %258 = vector.shape_cast %257 : vector<16xf32> to vector<16x1xf32>
    %cst_46 = arith.constant 3.200000e+01 : f32
    %259 = vector.broadcast %cst_46 : f32 to vector<16x1xf32>
    %260 = arith.divf %258, %259 : vector<16x1xf32>
    %261 = vector.broadcast %260 : vector<16x1xf32> to vector<16x32xf32>
    %262 = arith.subf %254, %261 : vector<16x32xf32>
    %263 = arith.mulf %262, %262 : vector<16x32xf32>
    %cst_47 = arith.constant dense<0.000000e+00> : vector<16xf32>
    %264 = vector.multi_reduction <add>, %263, %cst_47 [1] : vector<16x32xf32> to vector<16xf32>
    %265 = vector.shape_cast %264 : vector<16xf32> to vector<16x1xf32>
    %cst_48 = arith.constant 3.200000e+01 : f32
    %266 = vector.broadcast %cst_48 : f32 to vector<16x1xf32>
    %267 = arith.divf %265, %266 : vector<16x1xf32>
    %cst_49 = arith.constant 9.99999974E-6 : f32
    %268 = vector.broadcast %cst_49 : f32 to vector<16x1xf32>
    %269 = arith.addf %267, %268 : vector<16x1xf32>
    %270 = math.rsqrt %269 : vector<16x1xf32>
    %271 = vector.broadcast %270 : vector<16x1xf32> to vector<16x32xf32>
    %272 = arith.mulf %262, %271 : vector<16x32xf32>
    %273 = vector.broadcast %255 : vector<1x32xf32> to vector<16x32xf32>
    %274 = arith.mulf %272, %273 : vector<16x32xf32>
    %275 = vector.broadcast %256 : vector<1x32xf32> to vector<16x32xf32>
    %276 = arith.addf %274, %275 : vector<16x32xf32>
    %cst_50 = arith.constant dense<0.000000e+00> : vector<16x64xf32>
    %277 = tpu.matmul %276, %20, %cst_50 {dimension_numbers = #tpu.dot_dimension_numbers<[1], [0], [0], [1], [0, 0, 1, 1], [], []>} : vector<16x32xf32>, vector<32x64xf32>, vector<16x64xf32> -> vector<16x64xf32>
    %278 = vector.broadcast %26 : vector<1x64xf32> to vector<16x64xf32>
    %279 = arith.addf %277, %278 : vector<16x64xf32>
    %cst_51 = arith.constant 0.000000e+00 : f32
    %280 = vector.broadcast %cst_51 : f32 to vector<16x64xf32>
    %281 = arith.maximumf %279, %280 : vector<16x64xf32>
    %cst_52 = arith.constant dense<0.000000e+00> : vector<16x32xf32>
    %282 = tpu.matmul %281, %22, %cst_52 {dimension_numbers = #tpu.dot_dimension_numbers<[1], [0], [0], [1], [0, 0, 1, 1], [], []>} : vector<16x64xf32>, vector<64x32xf32>, vector<16x32xf32> -> vector<16x32xf32>
    %283 = vector.extract_strided_slice %24 {offsets = [8, 0], sizes = [1, 32], strides = [1, 1]} : vector<17x32xf32> to vector<1x32xf32>
    %284 = vector.broadcast %283 : vector<1x32xf32> to vector<16x32xf32>
    %285 = arith.addf %282, %284 : vector<16x32xf32>
    %286 = arith.addf %276, %285 : vector<16x32xf32>
    %287 = vector.extract_strided_slice %24 {offsets = [13, 0], sizes = [1, 32], strides = [1, 1]} : vector<17x32xf32> to vector<1x32xf32>
    %288 = vector.extract_strided_slice %24 {offsets = [14, 0], sizes = [1, 32], strides = [1, 1]} : vector<17x32xf32> to vector<1x32xf32>
    %cst_53 = arith.constant dense<0.000000e+00> : vector<16xf32>
    %289 = vector.multi_reduction <add>, %286, %cst_53 [1] : vector<16x32xf32> to vector<16xf32>
    %290 = vector.shape_cast %289 : vector<16xf32> to vector<16x1xf32>
    %cst_54 = arith.constant 3.200000e+01 : f32
    %291 = vector.broadcast %cst_54 : f32 to vector<16x1xf32>
    %292 = arith.divf %290, %291 : vector<16x1xf32>
    %293 = vector.broadcast %292 : vector<16x1xf32> to vector<16x32xf32>
    %294 = arith.subf %286, %293 : vector<16x32xf32>
    %295 = arith.mulf %294, %294 : vector<16x32xf32>
    %cst_55 = arith.constant dense<0.000000e+00> : vector<16xf32>
    %296 = vector.multi_reduction <add>, %295, %cst_55 [1] : vector<16x32xf32> to vector<16xf32>
    %297 = vector.shape_cast %296 : vector<16xf32> to vector<16x1xf32>
    %cst_56 = arith.constant 3.200000e+01 : f32
    %298 = vector.broadcast %cst_56 : f32 to vector<16x1xf32>
    %299 = arith.divf %297, %298 : vector<16x1xf32>
    %cst_57 = arith.constant 9.99999974E-6 : f32
    %300 = vector.broadcast %cst_57 : f32 to vector<16x1xf32>
    %301 = arith.addf %299, %300 : vector<16x1xf32>
    %302 = math.rsqrt %301 : vector<16x1xf32>
    %303 = vector.broadcast %302 : vector<16x1xf32> to vector<16x32xf32>
    %304 = arith.mulf %294, %303 : vector<16x32xf32>
    %305 = vector.broadcast %287 : vector<1x32xf32> to vector<16x32xf32>
    %306 = arith.mulf %304, %305 : vector<16x32xf32>
    %307 = vector.broadcast %288 : vector<1x32xf32> to vector<16x32xf32>
    %308 = arith.addf %306, %307 : vector<16x32xf32>
    %309 = vector.shape_cast %308 : vector<16x32xf32> to vector<2x8x32xf32>
    %c0_58 = arith.constant 0 : index
    %c0_59 = arith.constant 0 : index
    %c0_60 = arith.constant 0 : index
    %310 = vector.load %arg8[%c0_58, %c0_59, %c0_60] : memref<2x8x32xf32, #tpu.memory_space<vmem>>, vector<2x8x32xf32>
    tpu.vector_store %arg8[%c0_58, %c0_59, %c0_60], %309 {strides = array<i32>} : memref<2x8x32xf32, #tpu.memory_space<vmem>>, vector<2x8x32xf32>,
    %311 = vector.extract_strided_slice %24 {offsets = [15, 0], sizes = [1, 32], strides = [1, 1]} : vector<17x32xf32> to vector<1x32xf32>
    %312 = vector.extract_strided_slice %24 {offsets = [16, 0], sizes = [1, 32], strides = [1, 1]} : vector<17x32xf32> to vector<1x32xf32>
    %cst_61 = arith.constant dense<0.000000e+00> : vector<16xf32>
    %313 = vector.multi_reduction <add>, %308, %cst_61 [1] : vector<16x32xf32> to vector<16xf32>
    %314 = vector.shape_cast %313 : vector<16xf32> to vector<16x1xf32>
    %cst_62 = arith.constant 3.200000e+01 : f32
    %315 = vector.broadcast %cst_62 : f32 to vector<16x1xf32>
    %316 = arith.divf %314, %315 : vector<16x1xf32>
    %317 = vector.broadcast %316 : vector<16x1xf32> to vector<16x32xf32>
    %318 = arith.subf %308, %317 : vector<16x32xf32>
    %319 = arith.mulf %318, %318 : vector<16x32xf32>
    %cst_63 = arith.constant dense<0.000000e+00> : vector<16xf32>
    %320 = vector.multi_reduction <add>, %319, %cst_63 [1] : vector<16x32xf32> to vector<16xf32>
    %321 = vector.shape_cast %320 : vector<16xf32> to vector<16x1xf32>
    %cst_64 = arith.constant 3.200000e+01 : f32
    %322 = vector.broadcast %cst_64 : f32 to vector<16x1xf32>
    %323 = arith.divf %321, %322 : vector<16x1xf32>
    %cst_65 = arith.constant 9.99999974E-6 : f32
    %324 = vector.broadcast %cst_65 : f32 to vector<16x1xf32>
    %325 = arith.addf %323, %324 : vector<16x1xf32>
    %326 = math.rsqrt %325 : vector<16x1xf32>
    %327 = vector.broadcast %326 : vector<16x1xf32> to vector<16x32xf32>
    %328 = arith.mulf %318, %327 : vector<16x32xf32>
    %329 = vector.broadcast %311 : vector<1x32xf32> to vector<16x32xf32>
    %330 = arith.mulf %328, %329 : vector<16x32xf32>
    %331 = vector.broadcast %312 : vector<1x32xf32> to vector<16x32xf32>
    %332 = arith.addf %330, %331 : vector<16x32xf32>
    %333 = vector.shape_cast %332 : vector<16x32xf32> to vector<2x8x32xf32>
    %c0_66 = arith.constant 0 : index
    %c0_67 = arith.constant 0 : index
    %c0_68 = arith.constant 0 : index
    %c0_69 = arith.constant 0 : index
    %334 = vector.load %arg7[%c0_66, %c0_67, %c0_68, %c0_69] : memref<1x2x8x32xf32, #tpu.memory_space<vmem>>, vector<1x2x8x32xf32>
    %335 = vector.shape_cast %334 : vector<1x2x8x32xf32> to vector<2x8x32xf32>
    %336 = vector.shape_cast %333 : vector<2x8x32xf32> to vector<1x2x8x32xf32>
    tpu.vector_store %arg7[%c0_66, %c0_67, %c0_68, %c0_69], %336 {strides = array<i32>} : memref<1x2x8x32xf32, #tpu.memory_space<vmem>>, vector<1x2x8x32xf32>,
    return
  }
  func.func @transform_0(%arg0: i32) -> (i32, i32, i32, i32) {
    %c0_i32 = arith.constant 0 : i32
    %c0_i32_0 = arith.constant 0 : i32
    %c0_i32_1 = arith.constant 0 : i32
    %c0_i32_2 = arith.constant 0 : i32
    %c0_i32_3 = arith.constant 0 : i32
    return %c0_i32, %c0_i32_0, %c0_i32_1, %c0_i32_2 : i32, i32, i32, i32
  }
  func.func @transform_1(%arg0: i32) -> (i32, i32, i32, i32) {
    %c0_i32 = arith.constant 0 : i32
    %c0_i32_0 = arith.constant 0 : i32
    %c0_i32_1 = arith.constant 0 : i32
    %c0_i32_2 = arith.constant 0 : i32
    %c0_i32_3 = arith.constant 0 : i32
    return %c0_i32, %c0_i32_0, %c0_i32_1, %c0_i32_2 : i32, i32, i32, i32
  }
  func.func @transform_2(%arg0: i32) -> (i32, i32, i32) {
    %c0_i32 = arith.constant 0 : i32
    %c0_i32_0 = arith.constant 0 : i32
    %c0_i32_1 = arith.constant 0 : i32
    return %arg0, %c0_i32, %c0_i32_0 : i32, i32, i32
  }
  func.func @transform_3(%arg0: i32) -> (i32, i32, i32) {
    %c0_i32 = arith.constant 0 : i32
    %c0_i32_0 = arith.constant 0 : i32
    %c0_i32_1 = arith.constant 0 : i32
    return %arg0, %c0_i32, %c0_i32_0 : i32, i32, i32
  }
  func.func @transform_4(%arg0: i32) -> (i32, i32, i32) {
    %c0_i32 = arith.constant 0 : i32
    %c0_i32_0 = arith.constant 0 : i32
    %c0_i32_1 = arith.constant 0 : i32
    return %arg0, %c0_i32, %c0_i32_0 : i32, i32, i32
  }
  func.func @transform_5(%arg0: i32) -> (i32, i32, i32) {
    %c0_i32 = arith.constant 0 : i32
    %c0_i32_0 = arith.constant 0 : i32
    %c0_i32_1 = arith.constant 0 : i32
    return %arg0, %c0_i32, %c0_i32_0 : i32, i32, i32
  }
  func.func @transform_6(%arg0: i32) -> (i32, i32, i32, i32) {
    %c0_i32 = arith.constant 0 : i32
    %c0_i32_0 = arith.constant 0 : i32
    %c0_i32_1 = arith.constant 0 : i32
    %c0_i32_2 = arith.constant 0 : i32
    return %arg0, %c0_i32, %c0_i32_0, %c0_i32_1 : i32, i32, i32, i32
  }
}

</mosaic_0001>

<bundles_post_ra>
// kernel: transformer_decoder_fwd.1
= control target key start
LH: loop header
LB: loop body
LE: loop exit
PB: predicated region body
PF: predicated region fallthrough
CT: control target
= control target key end

     0   :  { %s2531_s21 = smov 0   ;;  %s2986_s0 = inlined_call_operand.vmem [shape: f32[2,2,8,32], index: 0, kind: input, shape index: {}]   ;;  %s2987_s1 = inlined_call_operand.vmem [shape: f32[2,2,16,32], index: 1, kind: input, shape index: {}]   ;;  %s2988_s2 = inlined_call_operand.vmem [shape: f32[2,32,320], index: 2, kind: input, shape index: {}]   ;;  %s2989_s3 = inlined_call_operand.vmem [shape: f32[2,64,32], index: 3, kind: input, shape index: {}]   ;;  %s2990_s4 = inlined_call_operand.vmem [shape: f32[2,17,32], index: 4, kind: input, shape index: {}]   ;;  %s2991_s5 = inlined_call_operand.vmem [shape: f32[2,1,64], index: 5, kind: input, shape index: {}]   ;;  %s2992_s6 = inlined_call_operand.vmem [shape: f32[2,2,8,32], index: 6, kind: output, shape index: {}]  }
   0x1 LB: > { %s2192_s22 = sadd.s32 4294967295, %s2484_s21   ;;  %p2196_p0 = scmp.ge.s32.totalorder %s2484_s21, 1  ;;  %s2484_s21 = sphi %s2531_s21, %s16_s21  }
   0x2   : > { %p240_p1 = scmp.lt.s32.totalorder %s2484_s21, 3 }
   0x4   : > { %p241_p2 = pnand %p2196_p0, %p240_p1 }
   0x5   : > { %p283_p3 = scmp.lt.s32.totalorder (!%p241_p2), %s2192_s22, 1  ;;  %p2203_p4 = scmp.ne.s32.totalorder (!%p241_p2), %s2192_s22, 0 }
   0x6   : > { %244 = sbr.rel (%p241_p2) target bundleno = 3728 (0xe90), region = 44 }
   0xb   : > { %s2539_s23 = scalar_select %p283_p3, %s2192_s22, 1 }
   0xd   : > { %s2292_s24 = smul.u32 96, %s2539_s23  ;;  %s2290_s25 = sshll.u32 %s2539_s23, 6 }
   0xe   : > { %s2546_s28 = scalar_lea.vmem %s2989_s3, %s2290_s25  ;;  %s2293_s29 = smul.u32 24, %s2539_s23 }
   0xf   : > { %s2552_s8 = scalar_lea.vmem %s2988_s2, %s2292_s24  ;;  %s300_s11 = scalar_lea.vmem %s2991_s5, %s2539_s23 }
  0x10   : > { %s2561_s14 = scalar_lea.vmem %s2990_s4, %s2293_s29  ;;  %s2291_s15 = sshll.u32 %s2539_s23, 4 }
  0x11   : > { %s2567_s18 = scalar_lea.vmem %s2992_s6, %s2291_s15  ;;  %309 = sbr.rel (%p2203_p4) target bundleno = 25 (0x19), region = 48 }
  0x16   : > { %v310_v0 = vld [vmem:[%s2986_s0] sm:$0xff]  ;;  %vm312_vm0 = vcmask 261120   ;;  %v311_v1 = vld [vmem:[%s2986_s0 + $0x8] sm:$0xff] }
  0x17   : > { %313 = vst.msk [vmem:[#allocation2] sm:$0xff] %vm312_vm0, %v310_v0 }
  0x18   : > { %314 = vst.msk [vmem:[#allocation2 + $0x8] sm:$0xff] %vm312_vm0, %v311_v1 }
  0x19 PF: > { %v2576_v2 = vld [vmem:[%s2552_s8 + $0x48] sm:$0xff]  ;;  %v335_v3 = vld [vmem:[%s2552_s8 + $0x30] sm:$0xff]  ;;  %v332_v6 = vld [vmem:[%s2552_s8 + $0x18] sm:$0xff]  ;;  %vm355_vm1 = vcmask 261120   ;;  %s2486_s27 = smov 32   ;;  %s2487_s7 = smov 112  }
  0x1a   : > { %374 = vmatpush.msra.mxu1 %v2576_v2  ;;  %v2585_v5 = vld [vmem:[%s2986_s0 + $0x10] sm:$0xff]  ;;  %v2589_v7 = vld [vmem:[%s2561_s14] sm:$0xff]  ;;  %v2602_v12 = vld [vmem:[%s2986_s0 + $0x18] sm:$0xff]  ;;  %s2488_s9 = smov 120   ;;  %s2489_s10 = smov 104   ;;  %vm491_vm2 = vcmask 64512   ;;  %v2631_v29 = vpack.i.bf16 %v335_v3, %v2576_v2 }
  0x1b   : > { %v388_v8 = vperm.slane %v2589_v7, 1  ;;  %v329_v9 = vld [vmem:[%s2552_s8] sm:$0xff]  ;;  %v385_v19 = vperm.slane %v2589_v7, 0  ;;  %s2490_s12 = smov 96   ;;  %s2491_s13 = smov 64   ;;  %v395_v2 = vperm.slane %v2589_v7, 2 }
  0x1c   : > { %375 = vmatpush.msra.mxu1 %v335_v3  ;;  %v2635_v30 = vpack.i.bf16 %v329_v9, %v332_v6  ;;  %s2492_s15 = smov 8   ;;  %s2493_s16 = smov 16   ;;  %vm983_vm3 = vcmask 130048   ;;  %vm985_vm4 = vcmask 195584  }
  0x1d   : > { %390 = vrot.lane.b32.xlu0 %v388_v8, %s2486_s27  ;;  %s2494_s17 = smov 24  }
  0x1e   : > { %v2580_v4 = vld [vmem:[#allocation2] sm:$0xff]  ;;  %376 = vmatpush.msra.mxu1 %v332_v6 }
  0x1f   : > { %v353_v10 = vadd.f32 %v2585_v5, %v2580_v4  ;;  %v2597_v11 = vld [vmem:[#allocation2 + $0x8] sm:$0xff] }
  0x20   : > { %377 = vmatpush.msra.mxu1 %v329_v9  ;;  %v354_v13 = vadd.f32 %v2602_v12, %v2597_v11 }
  0x21   : > { %2210 = vmatmul.msk.f32.vlgmr.msra.gmra.mxu1 %vm355_vm1, %v353_v10 }
  0x29   : > { %2211 = vmatmul.msk.f32.gmra.mxu1 %vm355_vm1, %v354_v13 }
  0x8f   : > { %v391_v14 = vpop.permute.xlu0 %390 }
  0x9e   : > { %v379_v15 = vpop.f32.mrf.mxu1 }
  0x9f   : > { %v393_v16 = vadd.f32 %v391_v14, %v379_v15  ;;  %v386_v20 = vadd.f32 %v385_v19, %v379_v15 }
  0xa1   : > { %458 = vrot.lane.b32.xlu1 %v393_v16, %s2487_s7  ;;  %456 = vrot.lane.b32.xlu0 %v393_v16, %s2488_s9 }
  0xa6   : > { %v382_v17 = vpop.f32.mrf.mxu1 }
  0xa7   : > { %v394_v18 = vadd.f32 %v391_v14, %v382_v17  ;;  %v387_v21 = vadd.f32 %v385_v19, %v382_v17 }
  0xa9   : > { %460 = vrot.lane.b32.xlu1 %v393_v16, %s2489_s10  ;;  %467 = vrot.lane.b32.xlu0 %v394_v18, %s2489_s10 }
  0xaa   : > { %463 = vrot.lane.b32.xlu2 %v394_v18, %s2488_s9 }
  0xb1   : > { %489 = vrot.lane.b32.xlu1 %v393_v16, %s2490_s12  ;;  %442 = vrot.lane.b32.xlu0 %v386_v20, %s2488_s9 }
  0xb2   : > { %465 = vrot.lane.b32.xlu2 %v394_v18, %s2487_s7 }
  0xb9   : > { %444 = vrot.lane.b32.xlu0 %v386_v20, %s2487_s7 }
  0xc1   : > { %449 = vrot.lane.b32.xlu0 %v387_v21, %s2488_s9 }
 0x104   : > { %v464_v24 = vpop.permute.xlu2 %463 }
 0x10c   : > { %v466_v28 = vpop.permute.xlu2 %465 }
 0x113   : > { %v459_v22 = vpop.permute.xlu1 %458  ;;  %v457_v23 = vpop.permute.xlu0 %456 }
 0x114   : > { %542 = vrot.lane.b32.xlu1 %v459_v22, %s2490_s12  ;;  %516 = vrot.lane.b32.xlu2 %v457_v23, %s2490_s12 }
 0x11b   : > { %v461_v25 = vpop.permute.xlu1 %460  ;;  %v468_v26 = vpop.permute.xlu0 %467 }
 0x11c   : > { %446 = vrot.lane.b32.xlu1 %v386_v20, %s2489_s10  ;;  %568 = vrot.lane.b32.xlu2 %v461_v25, %s2490_s12 }
 0x11d   : > { %672 = vrot.lane.b32.xlu0 %v468_v26, %s2490_s12 }
 0x123   : > { %v490_v27 = vpop.permute.xlu1 %489  ;;  %v443_v32 = vpop.permute.xlu0 %442 }
 0x124   : > { %2214 = vmatpush.xpose.msk.msra.mxu2 %vm491_vm2, %v490_v27  ;;  %620 = vrot.lane.b32.xlu2 %v464_v24, %s2490_s12 }
 0x125   : > { %646 = vrot.lane.b32.xlu1 %v466_v28, %s2490_s12  ;;  %2313 = vrot.lane.b32.xlu0 %v2631_v29, %s2491_s13 }
 0x127   : > { %2215 = vmatmul.msk.f32.vlgmr.msra.gmra.mxu2 %vm491_vm2, %v386_v20 }
 0x12b   : > { %v445_v37 = vpop.permute.xlu0 %444 }
 0x12c   : > { %451 = vrot.lane.b32.xlu2 %v387_v21, %s2487_s7 }
 0x12d   : > { %453 = vrot.lane.b32.xlu1 %v387_v21, %s2489_s10 }
 0x133   : > { %v450_v40 = vpop.permute.xlu0 %449 }
 0x134   : > { %594 = vrot.lane.b32.xlu2 %v394_v18, %s2490_s12 }
 0x135   : > { %2318 = vrot.lane.b32.xlu1 %v2635_v30, %s2491_s13 }
 0x16e   : > { %v517_v31 = vpop.permute.xlu2 %516 }
 0x16f   : > { %2216 = vmatpush.xpose.msk.msra.mxu3 %vm491_vm2, %v517_v31 }
 0x172   : > { %2217 = vmatmul.msk.f32.vlgmr.msra.gmra.mxu3 %vm491_vm2, %v443_v32 }
 0x176   : > { %v569_v33 = vpop.permute.xlu2 %568 }
 0x177   : > { %2220 = vmatpush.xpose.msk.msrb.mxu3 %vm491_vm2, %v569_v33 }
 0x17e   : > { %v621_v34 = vpop.permute.xlu2 %620 }
 0x17f   : > { %2224 = vmatpush.xpose.msk.msra.mxu3 %vm491_vm2, %v621_v34 }
 0x186   : > { %v543_v35 = vpop.permute.xlu1 %542  ;;  %v452_v36 = vpop.permute.xlu2 %451 }
 0x187   : > { %2218 = vmatpush.xpose.msk.msrb.mxu2 %vm491_vm2, %v543_v35 }
 0x18a   : > { %2219 = vmatmul.msk.f32.vlgmr.msrb.gmra.mxu2 %vm491_vm2, %v445_v37 }
 0x18e   : > { %v447_v38 = vpop.permute.xlu1 %446  ;;  %v595_v39 = vpop.permute.xlu2 %594 }
 0x18f   : > { %2221 = vmatmul.msk.f32.vlgmr.msrb.gmra.mxu3 %vm491_vm2, %v447_v38  ;;  %2222 = vmatpush.xpose.msk.msra.mxu2 %vm491_vm2, %v595_v39  ;;  %v673_v42 = vpop.permute.xlu0 %672 }
 0x192   : > { %2223 = vmatmul.msk.f32.vlgmr.msra.gmra.mxu2 %vm491_vm2, %v387_v21 }
 0x197   : > { %v647_v41 = vpop.permute.xlu1 %646  ;;  %2225 = vmatmul.msk.f32.vlgmr.msra.gmra.mxu3 %vm491_vm2, %v450_v40  ;;  %v2314_v46 = vpop.permute.xlu0 %2313 }
 0x198   : > { %2226 = vmatpush.xpose.msk.msra.mxu0 %vm491_vm2, %v647_v41  ;;  %v2315_v47 = vunpack.i.l.bf16 %v2314_v46  ;;  %v2316_v48 = vunpack.i.h.bf16 %v2314_v46 }
 0x19a   : > { %430 = vmatpush.msrb.mxu1 %v2315_v47 }
 0x19b   : > { %2227 = vmatmul.msk.f32.vlgmr.msra.gmra.mxu0 %vm491_vm2, %v452_v36 }
 0x19c   : > { %2228 = vmatpush.xpose.msk.msrb.mxu0 %vm491_vm2, %v673_v42  ;;  %431 = vmatpush.msrb.mxu1 %v2316_v48 }
 0x19f   : > { %v454_v43 = vpop.permute.xlu1 %453 }
 0x1a3   : > { %2229 = vmatmul.msk.f32.vlgmr.msrb.gmra.mxu0 %vm491_vm2, %v454_v43 }
 0x1a7   : > { %v2319_v49 = vpop.permute.xlu1 %2318 }
 0x1a8   : > { %v2320_v50 = vunpack.i.l.bf16 %v2319_v49  ;;  %v2321_v51 = vunpack.i.h.bf16 %v2319_v49 }
 0x1aa   : > { %v513_v44 = vpop.f32.mrf.mxu2  ;;  %432 = vmatpush.msrb.mxu1 %v2320_v50 }
 0x1ab   : > { %v698_v45 = vsel %vm491_vm2, %v513_v44, -inf }
 0x1ac   : > { %699 = vmax.xlane.f32.xlu1 %v698_v45  ;;  %433 = vmatpush.msrb.mxu1 %v2321_v51 }
 0x1ad   : > { %2212 = vmatmul.msk.f32.vlgmr.msrb.gmra.mxu1 %vm355_vm1, %v2580_v4 }
 0x1b5   : > { %2213 = vmatmul.msk.f32.gmra.mxu1 %vm355_vm1, %v2597_v11 }
 0x1f5   : > { %v539_v52 = vpop.f32.mrf.mxu3 }
 0x1f6   : > { %v701_v53 = vsel %vm491_vm2, %v539_v52, -inf }
 0x1f7   : > { %702 = vmax.xlane.f32.xlu2 %v701_v53 }
 0x20d   : > { %v565_v54 = vpop.f32.mrf.mxu2 }
 0x20e   : > { %v704_v55 = vsel %vm491_vm2, %v565_v54, -inf }
 0x20f   : > { %705 = vmax.xlane.f32.xlu0 %v704_v55 }
 0x212   : > { %v591_v56 = vpop.f32.mrf.mxu3 }
 0x213   : > { %v707_v57 = vsel %vm491_vm2, %v591_v56, -inf }
 0x214   : > { %708 = vmax.xlane.f32.xlu1 %v707_v57 }
 0x215   : > { %v2661_v58 = vpop.f32.mrf.mxu2 }
 0x216   : > { %v710_v59 = vsel %vm491_vm2, %v2661_v58, -inf }
 0x217   : > { %711 = vmax.xlane.f32.xlu0 %v710_v59 }
 0x218   : > { %v669_v60 = vpop.f32.mrf.mxu0 }
 0x219   : > { %v716_v61 = vsel %vm491_vm2, %v669_v60, -inf }
 0x21a   : > { %717 = vmax.xlane.f32.xlu2 %v716_v61  ;;  %v2666_v62 = vpop.f32.mrf.mxu3 }
 0x21b   : > { %v713_v0 = vsel %vm491_vm2, %v2666_v62, -inf }
 0x21f   : > { %v700_v19 = vpop.xlane.xlu1 %699 }
 0x220   : > { %v695_v63 = vpop.f32.mrf.mxu0  ;;  %v722_v23 = vsub.f32 %v513_v44, %v700_v19 }
 0x221   : > { %v719_v1 = vsel %vm491_vm2, %v695_v63, -inf }
 0x222   : > { %714 = vmax.xlane.f32.xlu2 %v713_v0  ;;  %720 = vmax.xlane.f32.xlu0 %v719_v1  ;;  %v730_v25 = vmul.f32 1.442695, %v722_v23 }
 0x22a   : > { %v435_v3 = vpop.f32.mrf.mxu1 }
 0x22b   : > { %v436_v6 = vadd.f32 %v435_v3, %v395_v2 }
 0x22d   : > { %804 = vmatpush.msrb.mxu2 %v436_v6 }
 0x232   : > { %v438_v27 = vpop.f32.mrf.mxu1 }
 0x233   : > { %v439_v31 = vadd.f32 %v438_v27, %v395_v2 }
 0x235   : > { %896 = vmatpush.msra.mxu2 %v439_v31 }
 0x236   : > { %470 = vrot.lane.b32.xlu0 %v436_v6, %s2488_s9 }
 0x26a   : > { %v703_v8 = vpop.xlane.xlu2 %702 }
 0x26b   : > { %v723_v9 = vsub.f32 %v539_v52, %v703_v8 }
 0x26d   : > { %v732_v10 = vmul.f32 1.442695, %v723_v9 }
 0x26f   : > { %2394 = vpow2.f32 %v732_v10 }
 0x275   : > { %v2395_v13 = vpop.eup %2394 }
 0x276   : > { %v749_v14 = vsel %vm491_vm2, %v2395_v13, 0.0 }
 0x277   : > { %750 = vadd.xlane.f32.xlu2 %v749_v14 }
 0x282   : > { %v706_v15 = vpop.xlane.xlu0 %705 }
 0x283   : > { %v724_v16 = vsub.f32 %v565_v54, %v706_v15 }
 0x285   : > { %v734_v17 = vmul.f32 1.442695, %v724_v16 }
 0x287   : > { %2396 = vpow2.f32 %v734_v17  ;;  %v709_v34 = vpop.xlane.xlu1 %708 }
 0x288   : > { %v725_v35 = vsub.f32 %v591_v56, %v709_v34 }
 0x28a   : > { %v736_v36 = vmul.f32 1.442695, %v725_v35  ;;  %v712_v38 = vpop.xlane.xlu0 %711 }
 0x28b   : > { %v726_v1 = vsub.f32 %v2661_v58, %v712_v38 }
 0x28d   : > { %v2397_v18 = vpop.eup %2396  ;;  %v718_v20 = vpop.xlane.xlu2 %717  ;;  %v738_v8 = vmul.f32 1.442695, %v726_v1 }
 0x28e   : > { %v728_v21 = vsub.f32 %v669_v60, %v718_v20  ;;  %v752_v22 = vsel %vm491_vm2, %v2397_v18, 0.0 }
 0x28f   : > { %753 = vadd.xlane.f32.xlu1 %v752_v22  ;;  %476 = vrot.lane.b32.xlu2 %v436_v6, %s2489_s10 }
 0x290   : > { %v742_v24 = vmul.f32 1.442695, %v728_v21 }
 0x292   : > { %2398 = vpow2.f32 %v742_v24 }
 0x293   : > { %2400 = vpow2.f32 %v730_v25 }
 0x294   : > { %2402 = vpow2.f32 %v736_v36 }
 0x295   : > { %v721_v40 = vpop.xlane.xlu0 %720  ;;  %v715_v46 = vpop.xlane.xlu2 %714 }
 0x296   : > { %v729_v41 = vsub.f32 %v695_v63, %v721_v40  ;;  %v727_v48 = vsub.f32 %v2666_v62, %v715_v46 }
 0x298   : > { %v2676_v26 = vpop.eup %2398  ;;  %v744_v42 = vmul.f32 1.442695, %v729_v41  ;;  %v740_v52 = vmul.f32 1.442695, %v727_v48 }
 0x299   : > { %v764_v28 = vsel %vm491_vm2, %v2676_v26, 0.0  ;;  %v2401_v32 = vpop.eup %2400 }
 0x29a   : > { %765 = vadd.xlane.f32.xlu0 %v764_v28  ;;  %v746_v33 = vsel %vm491_vm2, %v2401_v32, 0.0  ;;  %v2403_v37 = vpop.eup %2402  ;;  %2404 = vpow2.f32 %v744_v42 }
 0x29b   : > { %v755_v39 = vsel %vm491_vm2, %v2403_v37, 0.0 }
 0x2a0   : > { %v2683_v43 = vpop.eup %2404 }
 0x2a1   : > { %v767_v44 = vsel %vm491_vm2, %v2683_v43, 0.0 }
 0x2a2   : > { %747 = vadd.xlane.f32.xlu0 %v746_v33 }
 0x2a8   : > { %473 = vrot.lane.b32.xlu1 %v436_v6, %s2487_s7  ;;  %v471_v45 = vpop.permute.xlu0 %470 }
 0x2a9   : > { %827 = vmatpush.msrb.mxu3 %v471_v45 }
 0x2b6   : > { %2328 = vrot.lane.b32.xlu0 %v2635_v30, %s2486_s27 }
 0x2b8   : > { %756 = vadd.xlane.f32.xlu2 %v755_v39 }
 0x2d0   : > { %480 = vrot.lane.b32.xlu2 %v439_v31, %s2488_s9 }
 0x2d2   : > { %768 = vadd.xlane.f32.xlu1 %v767_v44 }
 0x2d8   : > { %483 = vrot.lane.b32.xlu2 %v439_v31, %s2487_s7 }
 0x2ea   : > { %v751_v47 = vpop.xlane.xlu2 %750 }
 0x2eb   : > { %2406 = vrcp.f32 %v751_v47  ;;  %2323 = vrot.lane.b32.xlu1 %v2631_v29, %s2486_s27 }
 0x2ec   : > { %2408 = vpow2.f32 %v740_v52 }
 0x2f1   : > { %v2407_v49 = vpop.eup %2406 }
 0x2f2   : > { %v779_v50 = vmul.f32 %v2407_v49, %v2395_v13  ;;  %v477_v51 = vpop.permute.xlu2 %476  ;;  %v2409_v53 = vpop.eup %2408 }
 0x2f3   : > { %873 = vmatpush.msra.mxu1 %v477_v51  ;;  %v761_v54 = vsel %vm491_vm2, %v2409_v53, 0.0  ;;  %v1002_v51 = vperm.slane %v2589_v7, 3 }
 0x2f4   : > { %2231 = vmatmul.msk.f32.vlgmr.msrb.gmra.mxu3 %vm491_vm2, %v779_v50 }
 0x301   : > { %762 = vadd.xlane.f32.xlu2 %v761_v54 }
 0x302   : > { %v754_v56 = vpop.xlane.xlu1 %753 }
 0x303   : > { %2410 = vrcp.f32 %v754_v56 }
 0x309   : > { %v2411_v59 = vpop.eup %2410 }
 0x30a   : > { %v780_v60 = vmul.f32 %v2411_v59, %v2397_v18 }
 0x30d   : > { %v766_v55 = vpop.xlane.xlu0 %765 }
 0x315   : > { %v748_v57 = vpop.xlane.xlu0 %747 }
 0x316   : > { %2412 = vrcp.f32 %v748_v57 }
 0x319   : > { %486 = vrot.lane.b32.xlu2 %v439_v31, %s2489_s10 }
 0x31a   : > { %v474_v61 = vpop.permute.xlu1 %473 }
 0x31b   : > { %850 = vmatpush.msra.mxu0 %v474_v61  ;;  %v2495_v61 = vmov 32.0  }
 0x31c   : > { %v2413_v62 = vpop.eup %2412  ;;  %2232 = vmatmul.msk.f32.vlgmr.msra.gmra.mxu0 %vm491_vm2, %v780_v60 }
 0x31d   : > { %v778_v63 = vmul.f32 %v2413_v62, %v2401_v32 }
 0x31f   : > { %2230 = vmatmul.msk.f32.vlgmr.msrb.gmra.mxu2 %vm491_vm2, %v778_v63 }
 0x328   : > { %v2329_v32 = vpop.permute.xlu0 %2328 }
 0x329   : > { %v2330_v33 = vunpack.i.l.bf16 %v2329_v32  ;;  %v2331_v34 = vunpack.i.h.bf16 %v2329_v32 }
 0x32b   : > { %v757_v0 = vpop.xlane.xlu2 %756 }
 0x32c   : > { %2414 = vrcp.f32 %v757_v0 }
 0x32d   : > { %2416 = vrcp.f32 %v766_v55 }
 0x32e   : > { %2418 = vpow2.f32 %v738_v8 }
 0x332   : > { %v2415_v2 = vpop.eup %2414 }
 0x333   : > { %v781_v3 = vmul.f32 %v2415_v2, %v2403_v37  ;;  %v481_v6 = vpop.permute.xlu2 %480  ;;  %v2417_v9 = vpop.eup %2416 }
 0x334   : > { %919 = vmatpush.msra.mxu3 %v481_v6  ;;  %v784_v10 = vmul.f32 %v2417_v9, %v2676_v26  ;;  %v2419_v14 = vpop.eup %2418 }
 0x335   : > { %2233 = vmatmul.msk.f32.vlgmr.msra.gmra.mxu1 %vm491_vm2, %v781_v3  ;;  %v758_v30 = vsel %vm491_vm2, %v2419_v14, 0.0 }
 0x33b   : > { %v484_v13 = vpop.permute.xlu2 %483 }
 0x33c   : > { %942 = vmatpush.msrb.mxu0 %v484_v13  ;;  %v339_v13 = vld [vmem:[%s2552_s8 + $0x50] sm:$0xff] }
 0x33d   : > { %2236 = vmatmul.msk.f32.vlgmr.msrb.gmra.mxu0 %vm491_vm2, %v784_v10  ;;  %v336_v10 = vld [vmem:[%s2552_s8 + $0x38] sm:$0xff]  ;;  %1124 = vmatpush.msrb.mxu3 %v339_v13 }
 0x33f   : > { %1125 = vmatpush.msrb.mxu3 %v336_v10 }
 0x342   : > { %759 = vadd.xlane.f32.xlu2 %v758_v30  ;;  %v333_v30 = vld [vmem:[%s2552_s8 + $0x20] sm:$0xff] }
 0x343   : > { %1126 = vmatpush.msrb.mxu3 %v333_v30 }
 0x345   : > { %v769_v58 = vpop.xlane.xlu1 %768 }
 0x346   : > { %2420 = vrcp.f32 %v769_v58  ;;  %v330_v58 = vld [vmem:[%s2552_s8 + $0x8] sm:$0xff] }
 0x347   : > { %1127 = vmatpush.msrb.mxu3 %v330_v58 }
 0x34c   : > { %v2421_v17 = vpop.eup %2420 }
 0x34d   : > { %v785_v19 = vmul.f32 %v2421_v17, %v2683_v43 }
 0x35d   : > { %v2324_v27 = vpop.permute.xlu1 %2323 }
 0x35e   : > { %v2326_v28 = vunpack.i.h.bf16 %v2324_v27  ;;  %v2325_v31 = vunpack.i.l.bf16 %v2324_v27  ;;  %v2747_v27 = vld [vmem:[%s2561_s14 + $0x8] sm:$0xff] }
 0x35f   : > { %v1097_v32 = vperm.slane %v2747_v27, 1 }
 0x360   : > { %1033 = vmatpush.msrb.mxu2 %v2325_v31 }
 0x362   : > { %1034 = vmatpush.msrb.mxu2 %v2326_v28 }
 0x364   : > { %1035 = vmatpush.msrb.mxu2 %v2330_v33 }
 0x366   : > { %1036 = vmatpush.msrb.mxu2 %v2331_v34  ;;  %v1100_v34 = vperm.slane %v2747_v27, 2 }
 0x374   : > { %v763_v15 = vpop.xlane.xlu2 %762 }
 0x375   : > { %2422 = vrcp.f32 %v763_v15 }
 0x377   : > { %v829_v16 = vpop.f32.mrf.mxu3 }
 0x378   : > { %971 = vrot.lane.b32.xlu0 %v829_v16, %s2492_s15 }
 0x37b   : > { %v2423_v18 = vpop.eup %2422 }
 0x37c   : > { %v783_v20 = vmul.f32 %v2423_v18, %v2409_v53  ;;  %v487_v21 = vpop.permute.xlu2 %486 }
 0x37d   : > { %965 = vmatpush.msrb.mxu1 %v487_v21 }
 0x37e   : > { %2235 = vmatmul.msk.f32.vlgmr.msra.gmra.mxu3 %vm491_vm2, %v783_v20  ;;  %2237 = vmatmul.msk.f32.vlgmr.msrb.gmra.mxu1 %vm491_vm2, %v785_v19  ;;  %v2741_v20 = vpack.i.bf16 %v330_v58, %v333_v30 }
 0x399   : > { %v852_v29 = vpop.f32.mrf.mxu0 }
 0x39a   : > { %975 = vrot.lane.b32.xlu1 %v852_v29, %s2493_s16 }
 0x3a2   : > { %v806_v39 = vpop.f32.mrf.mxu2 }
 0x3b2   : > { %v875_v22 = vpop.f32.mrf.mxu1 }
 0x3b3   : > { %979 = vrot.lane.b32.xlu0 %v875_v22, %s2494_s17 }
 0x3b5   : > { %v760_v23 = vpop.xlane.xlu2 %759 }
 0x3b6   : > { %2424 = vrcp.f32 %v760_v23 }
 0x3b7   : > { %2426 = vrcp.f32 %v2495_v61  ;;  %v2208_v61 = vld [vmem:[%s2987_s1 + $0x30] sm:$0xff] }
 0x3ba   : > { %v944_v24 = vpop.f32.mrf.mxu0 }
 0x3bb   : > { %992 = vrot.lane.b32.xlu2 %v944_v24, %s2493_s16 }
 0x3bc   : > { %v2425_v25 = vpop.eup %2424 }
 0x3bd   : > { %v782_v26 = vmul.f32 %v2425_v25, %v2419_v14  ;;  %v2427_v62 = vpop.eup %2426  ;;  %v2733_v14 = vpack.i.bf16 %v336_v10, %v339_v13 }
 0x3be   : > { %v1053_v63 = vmul.f32 32.0, %v2427_v62  ;;  %vm1057_vm5 = vweird.f32 %v2427_v62 }
 0x3bf   : > { %2234 = vmatmul.msk.f32.vlgmr.msra.gmra.mxu2 %vm491_vm2, %v782_v26 }
 0x3c0   : > { %v1054_v0 = vsub.f32 1.0, %v1053_v63 }
 0x3c2   : > { %v1055_v1 = vmul.f32 %v2427_v62, %v1054_v0 }
 0x3ea   : > { %v972_v37 = vpop.permute.xlu0 %971 }
 0x3eb   : > { %v982_v40 = vsel %vm491_vm2, %v806_v39, %v972_v37 }
 0x3fb   : > { %v967_v35 = vpop.f32.mrf.mxu1 }
 0x3fc   : > { %996 = vrot.lane.b32.xlu0 %v967_v35, %s2494_s17 }
 0x401   : > { %v921_v36 = vpop.f32.mrf.mxu3 }
 0x402   : > { %988 = vrot.lane.b32.xlu1 %v921_v36, %s2492_s15 }
 0x40c   : > { %v976_v38 = vpop.permute.xlu1 %975 }
 0x40d   : > { %v984_v41 = vsel %vm983_vm3, %v982_v40, %v976_v38 }
 0x415   : > { %v993_v46 = vpop.permute.xlu2 %992 }
 0x425   : > { %v980_v42 = vpop.permute.xlu0 %979 }
 0x426   : > { %v986_v43 = vsel %vm985_vm4, %v984_v41, %v980_v42 }
 0x427   : > { %2238 = vmatmul.msk.f32.vlgmr.msrb.gmra.mxu2 %vm355_vm1, %v986_v43 }
 0x442   : > { %v898_v44 = vpop.f32.mrf.mxu2 }
 0x46e   : > { %v997_v48 = vpop.permute.xlu0 %996 }
 0x474   : > { %v989_v45 = vpop.permute.xlu1 %988 }
 0x475   : > { %v999_v47 = vsel %vm491_vm2, %v898_v44, %v989_v45 }
 0x476   : > { %v1000_v49 = vsel %vm983_vm3, %v999_v47, %v993_v46 }
 0x477   : > { %v1001_v50 = vsel %vm985_vm4, %v1000_v49, %v997_v48 }
 0x478   : > { %2239 = vmatmul.msk.f32.gmra.mxu2 %vm355_vm1, %v1001_v50 }
 0x4aa   : > { %v1038_v52 = vpop.f32.mrf.mxu2 }
 0x4ab   : > { %v1039_v53 = vadd.f32 %v1038_v52, %v1002_v51 }
 0x4ad   : > { %v1044_v54 = vadd.f32 %v1039_v53, %v2580_v4  ;;  %v1056_v4 = vadd.f32 %v2427_v62, %v1055_v1 }
 0x4af   : > { %v1046_v55 = vsel %vm355_vm1, %v1044_v54, 0.0  ;;  %v2727_v2 = vsel %vm1057_vm5, %v2427_v62, %v1056_v4  ;;  %v2209_v62 = vld [vmem:[%s2987_s1 + $0x38] sm:$0xff] }
 0x4b0   : > { %1047 = vadd.xlane.f32.xlu1 %v1046_v55 }
 0x4c9   : > { %2333 = vrot.lane.b32.xlu1 %v2733_v14, %s2490_s12 }
 0x4fb   : > { %v1041_v56 = vpop.f32.mrf.mxu2 }
 0x4fc   : > { %v1042_v57 = vadd.f32 %v1041_v56, %v1002_v51 }
 0x4fe   : > { %v1045_v59 = vadd.f32 %v1042_v57, %v2597_v11 }
 0x500   : > { %v1049_v60 = vsel %vm355_vm1, %v1045_v59, 0.0 }
 0x501   : > { %1050 = vadd.xlane.f32.xlu0 %v1049_v60  ;;  %v2207_v60 = vld [vmem:[%s2987_s1 + $0x28] sm:$0xff] }
 0x523   : > { %v1048_v3 = vpop.xlane.xlu1 %1047 }
 0x524   : > { %v1059_v11 = vmul.f32 %v2727_v2, %v1048_v3  ;;  %v1105_v3 = vperm.slane %v2589_v7, 4 }
 0x526   : > { %v1061_v6 = vsub.f32 %v1044_v54, %v1059_v11  ;;  %v2206_v54 = vld [vmem:[%s2987_s1 + $0x20] sm:$0xff] }
 0x528   : > { %v1063_v8 = vmul.f32 %v1061_v6, %v1061_v6 }
 0x52a   : > { %v1065_v9 = vsel %vm355_vm1, %v1063_v8, 0.0 }
 0x52b   : > { %1066 = vadd.xlane.f32.xlu2 %v1065_v9 }
 0x53b   : > { %v2334_v39 = vpop.permute.xlu1 %2333 }
 0x53c   : > { %v2335_v40 = vunpack.i.l.bf16 %v2334_v39  ;;  %v2336_v41 = vunpack.i.h.bf16 %v2334_v39  ;;  %v322_v39 = vld [vmem:[%s2987_s1 + $0x10] sm:$0xff] }
 0x53e   : > { %1176 = vmatpush.msra.mxu0 %v2335_v40 }
 0x540   : > { %1177 = vmatpush.msra.mxu0 %v2336_v41 }
 0x543   : > { %2343 = vrot.lane.b32.xlu2 %v2733_v14, %s2491_s13 }
 0x574   : > { %v1051_v15 = vpop.xlane.xlu0 %1050 }
 0x575   : > { %v1060_v16 = vmul.f32 %v2727_v2, %v1051_v15 }
 0x577   : > { %v1062_v17 = vsub.f32 %v1045_v59, %v1060_v16 }
 0x579   : > { %v1064_v18 = vmul.f32 %v1062_v17, %v1062_v17 }
 0x57b   : > { %v1068_v19 = vsel %vm355_vm1, %v1064_v18, 0.0 }
 0x57c   : > { %1069 = vadd.xlane.f32.xlu0 %v1068_v19 }
 0x590   : > { %2338 = vrot.lane.b32.xlu0 %v2741_v20, %s2490_s12 }
 0x59e   : > { %v1067_v21 = vpop.xlane.xlu2 %1066 }
 0x59f   : > { %v1071_v29 = vmul.f32 %v1067_v21, %v2727_v2 }
 0x5a1   : > { %v1073_v22 = vadd.f32 1e-05, %v1071_v29 }
 0x5a3   : > { %2428 = vrsqrt.f32 %v1073_v22  ;;  %vm1081_vm7 = vweird.f32 %v1073_v22 }
 0x5a6   : > { %v2344_v30 = vpop.permute.xlu2 %2343 }
 0x5a7   : > { %v2346_v58 = vunpack.i.h.bf16 %v2344_v30  ;;  %v2345_v15 = vunpack.i.l.bf16 %v2344_v30 }
 0x5a9   : > { %v2429_v23 = vpop.eup %2428  ;;  %1230 = vmatpush.msra.mxu1 %v2345_v15 }
 0x5aa   : > { %v1076_v24 = vmul.f32 %v2429_v23, %v1073_v22  ;;  %vm1082_vm6 = vweird.f32 %v2429_v23 }
 0x5ab   : > { %vm1083_vm8 = vmor %vm1081_vm7, %vm1082_vm6  ;;  %1231 = vmatpush.msra.mxu1 %v2346_v58 }
 0x5ac   : > { %v1077_v25 = vmul.f32 %v2429_v23, %v1076_v24 }
 0x5ae   : > { %v1078_v26 = vmul.f32 0.5, %v1077_v25 }
 0x5b0   : > { %v1079_v28 = vsub.f32 1.5, %v1078_v26 }
 0x5b2   : > { %v1080_v31 = vmul.f32 %v2429_v23, %v1079_v28 }
 0x5b4   : > { %v1084_v33 = vsel %vm1083_vm8, %v2429_v23, %v1080_v31  ;;  %v320_v31 = vld [vmem:[%s2987_s1] sm:$0xff] }
 0x5b5   : > { %v1095_v35 = vmul.f32 %v1084_v33, %v1061_v6 }
 0x5b7   : > { %v1098_v36 = vmul.f32 %v1097_v32, %v1095_v35  ;;  %v321_v35 = vld [vmem:[%s2987_s1 + $0x8] sm:$0xff] }
 0x5b9   : > { %v2751_v37 = vadd.f32 %v1100_v34, %v1098_v36 }
 0x5bb   : > { %v1103_v38 = vadd.f32 %v2585_v5, %v2751_v37 }
 0x5bd   : > { %2240 = vmatmul.msk.f32.vlgmr.msrb.gmra.mxu3 %vm355_vm1, %v1103_v38 }
 0x5ef   : > { %v1070_v42 = vpop.xlane.xlu0 %1069 }
 0x5f0   : > { %v1072_v43 = vmul.f32 %v1070_v42, %v2727_v2  ;;  %v323_v42 = vld [vmem:[%s2987_s1 + $0x18] sm:$0xff] }
 0x5f2   : > { %v1074_v44 = vadd.f32 1e-05, %v1072_v43 }
 0x5f4   : > { %2430 = vrsqrt.f32 %v1074_v44  ;;  %vm1091_vm10 = vweird.f32 %v1074_v44 }
 0x5fa   : > { %v2431_v45 = vpop.eup %2430 }
 0x5fb   : > { %v1086_v46 = vmul.f32 %v2431_v45, %v1074_v44  ;;  %vm1092_vm9 = vweird.f32 %v2431_v45 }
 0x5fc   : > { %vm1093_vm11 = vmor %vm1091_vm10, %vm1092_vm9 }
 0x5fd   : > { %v1087_v47 = vmul.f32 %v2431_v45, %v1086_v46 }
 0x5ff   : > { %v1088_v48 = vmul.f32 0.5, %v1087_v47 }
 0x601   : > { %v1089_v49 = vsub.f32 1.5, %v1088_v48  ;;  %v1193_v48 = vperm.slane %v2589_v7, 6 }
 0x602   : > { %v2339_v50 = vpop.permute.xlu0 %2338 }
 0x603   : > { %v1090_v5 = vmul.f32 %v2431_v45, %v1089_v49  ;;  %v2340_v51 = vunpack.i.l.bf16 %v2339_v50  ;;  %v2341_v53 = vunpack.i.h.bf16 %v2339_v50 }
 0x605   : > { %v1094_v52 = vsel %vm1093_vm11, %v2431_v45, %v1090_v5  ;;  %1178 = vmatpush.msra.mxu0 %v2340_v51 }
 0x606   : > { %v1096_v55 = vmul.f32 %v1094_v52, %v1062_v17 }
 0x607   : > { %1179 = vmatpush.msra.mxu0 %v2341_v53 }
 0x608   : > { %2242 = vmatmul.msk.f32.vlgmr.msra.gmra.mxu0 %vm355_vm1, %v2206_v54  ;;  %v1099_v56 = vmul.f32 %v1097_v32, %v1096_v55 }
 0x60a   : > { %v2761_v57 = vadd.f32 %v1100_v34, %v1099_v56 }
 0x60c   : > { %v1104_v59 = vadd.f32 %v2602_v12, %v2761_v57  ;;  %v1135_v12 = vperm.slane %v2589_v7, 5 }
 0x60e   : > { %2241 = vmatmul.msk.f32.gmra.mxu3 %vm355_vm1, %v1104_v59 }
 0x610   : > { %2243 = vmatmul.msk.f32.gmra.mxu0 %vm355_vm1, %v2207_v60 }
 0x618   : > { %2244 = vmatmul.msk.f32.gmra.mxu0 %vm355_vm1, %v2208_v61 }
 0x620   : > { %2245 = vmatmul.msk.f32.gmra.mxu0 %vm355_vm1, %v2209_v62 }
 0x640   : > { %v1129_v11 = vpop.f32.mrf.mxu3 }
 0x641   : > { %v1130_v6 = vadd.f32 %v1129_v11, %v1105_v3 }
 0x685   : > { %v1181_v63 = vpop.f32.mrf.mxu0 }
 0x686   : > { %v1182_v0 = vadd.f32 %v1181_v63, %v1135_v12 }
 0x688   : > { %1271 = vrot.lane.b32.xlu2 %v1182_v0, %s2489_s10  ;;  %1263 = vrot.lane.b32.xlu0 %v1182_v0, %s2488_s9 }
 0x68d   : > { %v1184_v1 = vpop.f32.mrf.mxu0 }
 0x68e   : > { %v1185_v4 = vadd.f32 %v1184_v1, %v1135_v12 }
 0x690   : > { %1265 = vrot.lane.b32.xlu1 %v1185_v4, %s2488_s9  ;;  %2250 = vmatpush.xpose.msk.msra.mxu2 %vm491_vm2, %v1185_v4 }
 0x691   : > { %1273 = vrot.lane.b32.xlu0 %v1185_v4, %s2489_s10  ;;  %v1132_v16 = vpop.f32.mrf.mxu3 }
 0x692   : > { %v1133_v17 = vadd.f32 %v1132_v16, %v1105_v3 }
 0x694   : > { %2251 = vmatpush.xpose.msk.msra.mxu2 %vm491_vm2, %v1182_v0 }
 0x695   : > { %v1187_v8 = vpop.f32.mrf.mxu0 }
 0x696   : > { %v1188_v9 = vadd.f32 %v1187_v8, %v1135_v12 }
 0x697   : > { %2252 = vmatmul.msk.f32.vlgmr.msra.gmra.mxu2 %vm491_vm2, %v1130_v6 }
 0x698   : > { %2348 = vrot.lane.b32.xlu1 %v2741_v20, %s2491_s13 }
 0x699   : > { %1269 = vrot.lane.b32.xlu0 %v1185_v4, %s2487_s7 }
 0x69d   : > { %v1190_v10 = vpop.f32.mrf.mxu0 }
 0x69e   : > { %v1191_v13 = vadd.f32 %v1190_v10, %v1135_v12 }
 0x6a0   : > { %1267 = vrot.lane.b32.xlu1 %v1182_v0, %s2487_s7  ;;  %1279 = vrot.lane.b32.xlu2 %v1191_v13, %s2488_s9 }
 0x6a1   : > { %1277 = vrot.lane.b32.xlu0 %v1188_v9, %s2488_s9 }
 0x6a8   : > { %1248 = vrot.lane.b32.xlu1 %v1130_v6, %s2488_s9  ;;  %1250 = vrot.lane.b32.xlu2 %v1130_v6, %s2487_s7 }
 0x6a9   : > { %1283 = vrot.lane.b32.xlu0 %v1191_v13, %s2487_s7 }
 0x6b0   : > { %1252 = vrot.lane.b32.xlu1 %v1130_v6, %s2489_s10  ;;  %1287 = vrot.lane.b32.xlu2 %v1191_v13, %s2489_s10 }
 0x6b1   : > { %1285 = vrot.lane.b32.xlu0 %v1188_v9, %s2489_s10 }
 0x6b8   : > { %1255 = vrot.lane.b32.xlu1 %v1133_v17, %s2488_s9  ;;  %1257 = vrot.lane.b32.xlu2 %v1133_v17, %s2487_s7 }
 0x6c0   : > { %1281 = vrot.lane.b32.xlu1 %v1188_v9, %s2487_s7 }
 0x6c8   : > { %1259 = vrot.lane.b32.xlu1 %v1133_v17, %s2489_s10 }
 0x6e2   : > { %v1272_v18 = vpop.permute.xlu2 %1271 }
 0x6fa   : > { %v1264_v19 = vpop.permute.xlu0 %1263  ;;  %v1280_v21 = vpop.permute.xlu2 %1279 }
 0x702   : > { %v1266_v29 = vpop.permute.xlu1 %1265  ;;  %v1251_v23 = vpop.permute.xlu2 %1250 }
 0x703   : > { %v1274_v22 = vpop.permute.xlu0 %1273  ;;  %2253 = vmatpush.xpose.msk.msra.mxu3 %vm491_vm2, %v1266_v29 }
 0x707   : > { %2254 = vmatpush.xpose.msk.msra.mxu3 %vm491_vm2, %v1264_v19 }
 0x70a   : > { %v2349_v24 = vpop.permute.xlu1 %2348  ;;  %v1288_v32 = vpop.permute.xlu2 %1287 }
 0x70b   : > { %2259 = vmatpush.xpose.msk.msrb.mxu3 %vm491_vm2, %v1274_v22  ;;  %v2350_v25 = vunpack.i.l.bf16 %v2349_v24  ;;  %v1270_v26 = vpop.permute.xlu0 %1269  ;;  %v2351_v28 = vunpack.i.h.bf16 %v2349_v24 }
 0x70c   : > { %2256 = vmatpush.xpose.msk.msrb.mxu2 %vm491_vm2, %v1270_v26 }
 0x70d   : > { %1232 = vmatpush.msra.mxu1 %v2350_v25 }
 0x70f   : > { %2260 = vmatpush.xpose.msk.msrb.mxu3 %vm491_vm2, %v1272_v18  ;;  %1233 = vmatpush.msra.mxu1 %v2351_v28 }
 0x710   : > { %2246 = vmatmul.msk.f32.vlgmr.msra.gmra.mxu1 %vm355_vm1, %v320_v31 }
 0x711   : > { %2271 = vmatpush.xpose.msk.msrb.mxu1 %vm491_vm2, %v1288_v32 }
 0x712   : > { %v1268_v33 = vpop.permute.xlu1 %1267  ;;  %v1258_v45 = vpop.permute.xlu2 %1257 }
 0x713   : > { %v1278_v34 = vpop.permute.xlu0 %1277  ;;  %2257 = vmatpush.xpose.msk.msrb.mxu2 %vm491_vm2, %v1268_v33 }
 0x716   : > { %2258 = vmatmul.msk.f32.vlgmr.msrb.gmra.mxu2 %vm491_vm2, %v1251_v23 }
 0x717   : > { %2262 = vmatpush.xpose.msk.msra.mxu2 %vm491_vm2, %v1191_v13 }
 0x718   : > { %2247 = vmatmul.msk.f32.gmra.mxu1 %vm355_vm1, %v321_v35 }
 0x71a   : > { %v1249_v36 = vpop.permute.xlu1 %1248  ;;  %v2843_v49 = vpop.f32.mrf.mxu2 }
 0x71b   : > { %2263 = vmatpush.xpose.msk.msra.mxu2 %vm491_vm2, %v1188_v9  ;;  %v1284_v38 = vpop.permute.xlu0 %1283  ;;  %2255 = vmatmul.msk.f32.vlgmr.msra.gmra.mxu3 %vm491_vm2, %v1249_v36  ;;  %v1537_v6 = vsel %vm983_vm3, %v2843_v49, -inf }
 0x71c   : > { %2265 = vmatpush.xpose.msk.msra.mxu3 %vm491_vm2, %v1280_v21  ;;  %2268 = vmatpush.xpose.msk.msrb.mxu0 %vm491_vm2, %v1284_v38 }
 0x71e   : > { %2264 = vmatmul.msk.f32.vlgmr.msra.gmra.mxu2 %vm491_vm2, %v1133_v17 }
 0x720   : > { %2266 = vmatpush.xpose.msk.msra.mxu3 %vm491_vm2, %v1278_v34  ;;  %2248 = vmatmul.msk.f32.gmra.mxu1 %vm355_vm1, %v322_v39 }
 0x722   : > { %v1253_v40 = vpop.permute.xlu1 %1252 }
 0x723   : > { %v1286_v41 = vpop.permute.xlu0 %1285  ;;  %2261 = vmatmul.msk.f32.vlgmr.msrb.gmra.mxu3 %vm491_vm2, %v1253_v40 }
 0x724   : > { %2272 = vmatpush.xpose.msk.msrb.mxu1 %vm491_vm2, %v1286_v41 }
 0x728   : > { %2249 = vmatmul.msk.f32.gmra.mxu1 %vm355_vm1, %v323_v42 }
 0x72a   : > { %v1256_v43 = vpop.permute.xlu1 %1255 }
 0x72b   : > { %2267 = vmatmul.msk.f32.vlgmr.msra.gmra.mxu3 %vm491_vm2, %v1256_v43 }
 0x732   : > { %v1282_v44 = vpop.permute.xlu1 %1281 }
 0x733   : > { %2269 = vmatpush.xpose.msk.msrb.mxu0 %vm491_vm2, %v1282_v44 }
 0x736   : > { %2270 = vmatmul.msk.f32.vlgmr.msrb.gmra.mxu0 %vm491_vm2, %v1258_v45 }
 0x73a   : > { %v1260_v46 = vpop.permute.xlu1 %1259 }
 0x73b   : > { %2273 = vmatmul.msk.f32.vlgmr.msrb.gmra.mxu1 %vm491_vm2, %v1260_v46 }
 0x78d   : > { %v1235_v47 = vpop.f32.mrf.mxu1 }
 0x78e   : > { %v1236_v50 = vadd.f32 %v1235_v47, %v1193_v48 }
 0x795   : > { %v1238_v5 = vpop.f32.mrf.mxu1 }
 0x796   : > { %v1239_v51 = vadd.f32 %v1238_v5, %v1193_v48 }
 0x798   : > { %1642 = vmatpush.msrb.mxu2 %v1239_v51  ;;  %v2352_v52 = vpack.i.bf16 %v1236_v50, %v1239_v51 }
 0x799   : > { %v1404_v53 = vpop.f32.mrf.mxu2 }
 0x79a   : > { %2353 = vrot.lane.b32.xlu0 %v2352_v52, %s2488_s9  ;;  %1643 = vmatpush.msrb.mxu2 %v1236_v50  ;;  %v1543_v54 = vsel %vm983_vm3, %v1404_v53, -inf }
 0x79b   : > { %1544 = vmax.xlane.f32.xlu2 %v1543_v54 }
 0x79d   : > { %v1241_v55 = vpop.f32.mrf.mxu1 }
 0x79e   : > { %v2847_v56 = vpop.f32.mrf.mxu3  ;;  %v1242_v62 = vadd.f32 %v1241_v55, %v1193_v48 }
 0x79f   : > { %v1540_v8 = vsel %vm983_vm3, %v2847_v56, -inf }
 0x7a1   : > { %v1456_v59 = vpop.f32.mrf.mxu2 }
 0x7a2   : > { %v1549_v7 = vsel %vm983_vm3, %v1456_v59, -inf }
 0x7a3   : > { %1550 = vmax.xlane.f32.xlu2 %v1549_v7 }
 0x7a5   : > { %v1244_v60 = vpop.f32.mrf.mxu1 }
 0x7a6   : > { %v2850_v61 = vpop.f32.mrf.mxu3  ;;  %v1245_v12 = vadd.f32 %v1244_v60, %v1193_v48 }
 0x7a7   : > { %v1546_v63 = vsel %vm983_vm3, %v2850_v61, -inf }
 0x7a8   : > { %1547 = vmax.xlane.f32.xlu1 %v1546_v63  ;;  %1734 = vmatpush.msra.mxu2 %v1245_v12  ;;  %v2859_v11 = vpack.i.bf16 %v1242_v62, %v1245_v12 }
 0x7aa   : > { %1735 = vmatpush.msra.mxu2 %v1242_v62 }
 0x7ae   : > { %v1482_v9 = vpop.f32.mrf.mxu3 }
 0x7af   : > { %v1552_v10 = vsel %vm983_vm3, %v1482_v9, -inf }
 0x7b3   : > { %v1508_v0 = vpop.f32.mrf.mxu0 }
 0x7b4   : > { %v1555_v1 = vsel %vm983_vm3, %v1508_v0, -inf }
 0x7b5   : > { %1556 = vmax.xlane.f32.xlu2 %v1555_v1 }
 0x7b8   : > { %v2855_v4 = vpop.f32.mrf.mxu1 }
 0x7b9   : > { %v1558_v3 = vsel %vm983_vm3, %v2855_v4, -inf }
 0x7ba   : > { %1559 = vmax.xlane.f32.xlu1 %v1558_v3 }
 0x7c4   : > { %1538 = vmax.xlane.f32.xlu0 %v1537_v6 }
 0x7cc   : > { %1541 = vmax.xlane.f32.xlu0 %v1540_v8 }
 0x7cd   : > { %2363 = vrot.lane.b32.xlu2 %v2352_v52, %s2489_s10 }
 0x7d3   : > { %2358 = vrot.lane.b32.xlu1 %v2352_v52, %s2487_s7 }
 0x7d4   : > { %1553 = vmax.xlane.f32.xlu0 %v1552_v10 }
 0x7e8   : > { %2368 = vrot.lane.b32.xlu0 %v2859_v11, %s2488_s9 }
 0x80c   : > { %v2354_v13 = vpop.permute.xlu0 %2353 }
 0x80d   : > { %v2355_v30 = vunpack.i.l.bf16 %v2354_v13  ;;  %v2356_v15 = vunpack.i.h.bf16 %v2354_v13 }
 0x80e   : > { %v1545_v58 = vpop.xlane.xlu2 %1544 }
 0x80f   : > { %v1563_v16 = vsub.f32 %v1404_v53, %v1545_v58  ;;  %1665 = vmatpush.msrb.mxu3 %v2355_v30 }
 0x811   : > { %v1573_v17 = vmul.f32 1.442695, %v1563_v16  ;;  %1666 = vmatpush.msrb.mxu3 %v2356_v15 }
 0x813   : > { %2432 = vpow2.f32 %v1573_v17 }
 0x816   : > { %v1551_v21 = vpop.xlane.xlu2 %1550 }
 0x817   : > { %v1565_v23 = vsub.f32 %v1456_v59, %v1551_v21 }
 0x819   : > { %v2870_v18 = vpop.eup %2432  ;;  %v1577_v25 = vmul.f32 1.442695, %v1565_v23 }
 0x81a   : > { %v1591_v19 = vsel %vm983_vm3, %v2870_v18, 0.0 }
 0x81b   : > { %1592 = vadd.xlane.f32.xlu2 %v1591_v19  ;;  %v1548_v34 = vpop.xlane.xlu1 %1547 }
 0x81c   : > { %v1564_v42 = vsub.f32 %v2850_v61, %v1548_v34 }
 0x81e   : > { %v1575_v45 = vmul.f32 1.442695, %v1564_v42 }
 0x828   : > { %v1557_v29 = vpop.xlane.xlu2 %1556 }
 0x829   : > { %v1567_v22 = vsub.f32 %v1508_v0, %v1557_v29 }
 0x82b   : > { %v1581_v24 = vmul.f32 1.442695, %v1567_v22 }
 0x82d   : > { %2434 = vpow2.f32 %v1581_v24  ;;  %v1560_v39 = vpop.xlane.xlu1 %1559 }
 0x82e   : > { %2436 = vpow2.f32 %v1577_v25  ;;  %v1568_v50 = vsub.f32 %v2855_v4, %v1560_v39 }
 0x830   : > { %v2364_v26 = vpop.permute.xlu2 %2363  ;;  %v1583_v53 = vmul.f32 1.442695, %v1568_v50 }
 0x831   : > { %v2365_v28 = vunpack.i.l.bf16 %v2364_v26  ;;  %v2366_v32 = vunpack.i.h.bf16 %v2364_v26 }
 0x833   : > { %v2874_v31 = vpop.eup %2434  ;;  %2373 = vrot.lane.b32.xlu2 %v2859_v11, %s2487_s7  ;;  %1711 = vmatpush.msra.mxu1 %v2365_v28 }
 0x834   : > { %v1603_v33 = vsel %vm983_vm3, %v2874_v31, 0.0  ;;  %v2880_v36 = vpop.eup %2436 }
 0x835   : > { %1604 = vadd.xlane.f32.xlu0 %v1603_v33  ;;  %1712 = vmatpush.msra.mxu1 %v2366_v32  ;;  %v1597_v38 = vsel %vm983_vm3, %v2880_v36, 0.0 }
 0x837   : > { %v1539_v35 = vpop.xlane.xlu0 %1538 }
 0x838   : > { %v1561_v0 = vsub.f32 %v2843_v49, %v1539_v35 }
 0x83a   : > { %v1569_v4 = vmul.f32 1.442695, %v1561_v0  ;;  %v2476_v0 = vld [vmem:[%s2561_s14] sm:$0xff] }
 0x83d   : > { %1598 = vadd.xlane.f32.xlu0 %v1597_v38 }
 0x83f   : > { %v1542_v40 = vpop.xlane.xlu0 %1541 }
 0x840   : > { %v1562_v41 = vsub.f32 %v2847_v56, %v1542_v40 }
 0x842   : > { %v1571_v43 = vmul.f32 1.442695, %v1562_v41 }
 0x844   : > { %2438 = vpow2.f32 %v1571_v43 }
 0x845   : > { %v2359_v44 = vpop.permute.xlu1 %2358  ;;  %2440 = vpow2.f32 %v1575_v45 }
 0x846   : > { %v2360_v46 = vunpack.i.l.bf16 %v2359_v44  ;;  %v2361_v48 = vunpack.i.h.bf16 %v2359_v44  ;;  %2442 = vpow2.f32 %v1583_v53 }
 0x847   : > { %v1554_v47 = vpop.xlane.xlu0 %1553 }
 0x848   : > { %1688 = vmatpush.msra.mxu0 %v2360_v46  ;;  %v1566_v51 = vsub.f32 %v1482_v9, %v1554_v47 }
 0x84a   : > { %v2439_v5 = vpop.eup %2438  ;;  %1689 = vmatpush.msra.mxu0 %v2361_v48  ;;  %v1579_v54 = vmul.f32 1.442695, %v1566_v51 }
 0x84b   : > { %v1588_v52 = vsel %vm983_vm3, %v2439_v5, 0.0  ;;  %v2441_v55 = vpop.eup %2440 }
 0x84c   : > { %1589 = vadd.xlane.f32.xlu1 %v1588_v52  ;;  %2444 = vpow2.f32 %v1579_v54  ;;  %v1594_v56 = vsel %vm983_vm3, %v2441_v55, 0.0  ;;  %v2443_v59 = vpop.eup %2442 }
 0x84d   : > { %v1606_v62 = vsel %vm983_vm3, %v2443_v59, 0.0 }
 0x851   : > { %2383 = vrot.lane.b32.xlu0 %v2733_v14, %s2486_s27 }
 0x852   : > { %v2445_v7 = vpop.eup %2444 }
 0x853   : > { %v1600_v12 = vsel %vm983_vm3, %v2445_v7, 0.0 }
 0x854   : > { %1595 = vadd.xlane.f32.xlu1 %v1594_v56 }
 0x85a   : > { %v2369_v60 = vpop.permute.xlu0 %2368 }
 0x85b   : > { %v2370_v61 = vunpack.i.l.bf16 %v2369_v60  ;;  %v2371_v63 = vunpack.i.h.bf16 %v2369_v60 }
 0x85c   : > { %1607 = vadd.xlane.f32.xlu1 %v1606_v62  ;;  %1601 = vadd.xlane.f32.xlu2 %v1600_v12 }
 0x85d   : > { %1757 = vmatpush.msra.mxu3 %v2370_v61 }
 0x85f   : > { %1758 = vmatpush.msra.mxu3 %v2371_v63 }
 0x874   : > { %2378 = vrot.lane.b32.xlu2 %v2859_v11, %s2489_s10 }
 0x88e   : > { %v1593_v1 = vpop.xlane.xlu2 %1592 }
 0x88f   : > { %2446 = vrcp.f32 %v1593_v1  ;;  %v1839_v1 = vperm.slane %v2476_v0, 7 }
 0x890   : > { %2448 = vpow2.f32 %v1569_v4 }
 0x895   : > { %v2447_v3 = vpop.eup %2446 }
 0x896   : > { %v1619_v6 = vmul.f32 %v2447_v3, %v2870_v18  ;;  %v2374_v8 = vpop.permute.xlu2 %2373  ;;  %v2449_v10 = vpop.eup %2448 }
 0x897   : > { %v2375_v9 = vunpack.i.l.bf16 %v2374_v8  ;;  %v2376_v13 = vunpack.i.h.bf16 %v2374_v8  ;;  %v1585_v30 = vsel %vm983_vm3, %v2449_v10, 0.0 }
 0x898   : > { %2276 = vmatmul.msk.f32.vlgmr.msra.gmra.mxu0 %vm983_vm3, %v1619_v6 }
 0x899   : > { %1780 = vmatpush.msrb.mxu0 %v2375_v9 }
 0x89b   : > { %1781 = vmatpush.msrb.mxu0 %v2376_v13 }
 0x89d   : > { %1586 = vadd.xlane.f32.xlu2 %v1585_v30 }
 0x8a8   : > { %v1605_v11 = vpop.xlane.xlu0 %1604 }
 0x8a9   : > { %2450 = vrcp.f32 %v1605_v11 }
 0x8af   : > { %v2451_v49 = vpop.eup %2450 }
 0x8b0   : > { %v1623_v58 = vmul.f32 %v2451_v49, %v2874_v31  ;;  %v1599_v33 = vpop.xlane.xlu0 %1598 }
 0x8b2   : > { %2280 = vmatmul.msk.f32.vlgmr.msrb.gmra.mxu0 %vm983_vm3, %v1623_v58 }
 0x8b5   : > { %2388 = vrot.lane.b32.xlu2 %v2741_v20, %s2486_s27 }
 0x8bf   : > { %v1590_v15 = vpop.xlane.xlu1 %1589 }
 0x8c0   : > { %2452 = vrcp.f32 %v1590_v15 }
 0x8c3   : > { %v2384_v41 = vpop.permute.xlu0 %2383 }
 0x8c4   : > { %v2386_v42 = vunpack.i.h.bf16 %v2384_v41  ;;  %v2385_v43 = vunpack.i.l.bf16 %v2384_v41  ;;  %v346_v41 = vld [vmem:[%s2546_s28 + $0x28] sm:$0xff] }
 0x8c6   : > { %v2453_v16 = vpop.eup %2452 }
 0x8c7   : > { %v1618_v17 = vmul.f32 %v2453_v16, %v2439_v5  ;;  %v1596_v18 = vpop.xlane.xlu1 %1595 }
 0x8c8   : > { %2454 = vrcp.f32 %v1596_v18 }
 0x8c9   : > { %2275 = vmatmul.msk.f32.vlgmr.msrb.gmra.mxu3 %vm983_vm3, %v1618_v17 }
 0x8ce   : > { %v2455_v19 = vpop.eup %2454 }
 0x8cf   : > { %v1620_v21 = vmul.f32 %v2455_v19, %v2441_v55  ;;  %v1608_v29 = vpop.xlane.xlu1 %1607  ;;  %v1602_v22 = vpop.xlane.xlu2 %1601 }
 0x8d0   : > { %2456 = vrcp.f32 %v1602_v22  ;;  %v334_v22 = vld [vmem:[%s2552_s8 + $0x28] sm:$0xff] }
 0x8d1   : > { %2277 = vmatmul.msk.f32.vlgmr.msra.gmra.mxu1 %vm983_vm3, %v1620_v21  ;;  %2458 = vrcp.f32 %v1608_v29  ;;  %v340_v21 = vld [vmem:[%s2552_s8 + $0x58] sm:$0xff]  ;;  %v337_v29 = vld [vmem:[%s2552_s8 + $0x40] sm:$0xff] }
 0x8d2   : > { %1954 = vmatpush.msrb.mxu3 %v340_v21 }
 0x8d4   : > { %1955 = vmatpush.msrb.mxu3 %v337_v29 }
 0x8d6   : > { %v2457_v23 = vpop.eup %2456  ;;  %1956 = vmatpush.msrb.mxu3 %v334_v22 }
 0x8d7   : > { %v2379_v24 = vpop.permute.xlu2 %2378  ;;  %v2459_v25 = vpop.eup %2458  ;;  %v1622_v26 = vmul.f32 %v2457_v23, %v2445_v7  ;;  %v331_v23 = vld [vmem:[%s2552_s8 + $0x10] sm:$0xff] }
 0x8d8   : > { %v2380_v14 = vunpack.i.l.bf16 %v2379_v24  ;;  %v2381_v28 = vunpack.i.h.bf16 %v2379_v24  ;;  %v1624_v31 = vmul.f32 %v2459_v25, %v2443_v59  ;;  %1957 = vmatpush.msrb.mxu3 %v331_v23 }
 0x8d9   : > { %2279 = vmatmul.msk.f32.vlgmr.msra.gmra.mxu3 %vm983_vm3, %v1622_v26 }
 0x8da   : > { %1803 = vmatpush.msrb.mxu1 %v2380_v14 }
 0x8dc   : > { %1804 = vmatpush.msrb.mxu1 %v2381_v28 }
 0x8dd   : > { %2281 = vmatmul.msk.f32.vlgmr.msrb.gmra.mxu1 %vm983_vm3, %v1624_v31 }
 0x910   : > { %v1587_v32 = vpop.xlane.xlu2 %1586 }
 0x911   : > { %2460 = vrcp.f32 %v1587_v32 }
 0x912   : > { %2462 = vrcp.f32 %v1599_v33 }
 0x915   : > { %v1691_v34 = vpop.f32.mrf.mxu0 }
 0x916   : > { %1814 = vrot.lane.b32.xlu0 %v1691_v34, %s2493_s16 }
 0x917   : > { %v2461_v35 = vpop.eup %2460 }
 0x918   : > { %v1617_v38 = vmul.f32 %v2461_v35, %v2449_v10  ;;  %v2463_v39 = vpop.eup %2462  ;;  %v2389_v20 = vpop.permute.xlu2 %2388  ;;  %v348_v35 = vld [vmem:[%s2546_s28 + $0x38] sm:$0xff] }
 0x919   : > { %v1621_v40 = vmul.f32 %v2463_v39, %v2880_v36  ;;  %v2391_v48 = vunpack.i.h.bf16 %v2389_v20  ;;  %v2390_v50 = vunpack.i.l.bf16 %v2389_v20  ;;  %v1927_v39 = vperm.slane %v2747_v27, 3  ;;  %1983 = vmatpush.msra.mxu0 %v348_v35  ;;  %v344_v20 = vld [vmem:[%s2546_s28 + $0x18] sm:$0xff] }
 0x91a   : > { %2274 = vmatmul.msk.f32.vlgmr.msrb.gmra.mxu2 %vm983_vm3, %v1617_v38  ;;  %v347_v38 = vld [vmem:[%s2546_s28 + $0x30] sm:$0xff]  ;;  %v2044_v35 = vperm.slane %v2747_v27, 5 }
 0x91b   : > { %1870 = vmatpush.msrb.mxu2 %v2385_v43  ;;  %1984 = vmatpush.msra.mxu0 %v347_v38 }
 0x91d   : > { %1871 = vmatpush.msrb.mxu2 %v2386_v42  ;;  %1985 = vmatpush.msra.mxu0 %v346_v41  ;;  %v2047_v41 = vperm.slane %v2747_v27, 6 }
 0x91f   : > { %1872 = vmatpush.msrb.mxu2 %v2390_v50 }
 0x921   : > { %1873 = vmatpush.msrb.mxu2 %v2391_v48 }
 0x922   : > { %2278 = vmatmul.msk.f32.vlgmr.msra.gmra.mxu2 %vm983_vm3, %v1621_v40 }
 0x92f   : > { %v1783_v46 = vpop.f32.mrf.mxu0 }
 0x94c   : > { %v1668_v44 = vpop.f32.mrf.mxu3 }
 0x94d   : > { %1810 = vrot.lane.b32.xlu1 %v1668_v44, %s2492_s15  ;;  %v1930_v44 = vperm.slane %v2747_v27, 4 }
 0x94e   : > { %v1714_v45 = vpop.f32.mrf.mxu1 }
 0x94f   : > { %1818 = vrot.lane.b32.xlu0 %v1714_v45, %s2494_s17 }
 0x957   : > { %1829 = vrot.lane.b32.xlu0 %v1783_v46, %s2493_s16  ;;  %v345_v46 = vld [vmem:[%s2546_s28 + $0x20] sm:$0xff] }
 0x958   : > { %1986 = vmatpush.msra.mxu0 %v345_v46 }
 0x95a   : > { %v1806_v47 = vpop.f32.mrf.mxu1  ;;  %1987 = vmatpush.msra.mxu0 %v344_v20 }
 0x95c   : > { %v1760_v36 = vpop.f32.mrf.mxu3 }
 0x95d   : > { %1825 = vrot.lane.b32.xlu1 %v1760_v36, %s2492_s15 }
 0x965   : > { %1833 = vrot.lane.b32.xlu1 %v1806_v47, %s2494_s17 }
 0x988   : > { %v1815_v5 = vpop.permute.xlu0 %1814 }
 0x99d   : > { %v1645_v51 = vpop.f32.mrf.mxu2 }
 0x9a5   : > { %v1737_v7 = vpop.f32.mrf.mxu2 }
 0x9bf   : > { %v1811_v52 = vpop.permute.xlu1 %1810 }
 0x9c0   : > { %v1821_v53 = vsel %vm491_vm2, %v1645_v51, %v1811_v52 }
 0x9c1   : > { %v1822_v54 = vsel %vm983_vm3, %v1821_v53, %v1815_v5  ;;  %v1819_v55 = vpop.permute.xlu0 %1818 }
 0x9c2   : > { %v1823_v56 = vsel %vm985_vm4, %v1822_v54, %v1819_v55 }
 0x9c3   : > { %2282 = vmatmul.msk.f32.vlgmr.msrb.gmra.mxu2 %vm355_vm1, %v1823_v56 }
 0x9c9   : > { %v1830_v61 = vpop.permute.xlu0 %1829 }
 0x9cf   : > { %v1826_v59 = vpop.permute.xlu1 %1825 }
 0x9d0   : > { %v1836_v60 = vsel %vm491_vm2, %v1737_v7, %v1826_v59 }
 0x9d1   : > { %v1837_v12 = vsel %vm983_vm3, %v1836_v60, %v1830_v61  ;;  %v343_v60 = vld [vmem:[%s2546_s28 + $0x10] sm:$0xff]  ;;  %v342_v61 = vld [vmem:[%s2546_s28 + $0x8] sm:$0xff]  ;;  %vm1968_vm3 = vcmask 523264  }
 0x9d2   : > { %1988 = vmatpush.msra.mxu0 %v343_v60 }
 0x9d4   : > { %1989 = vmatpush.msra.mxu0 %v342_v61 }
 0x9d7   : > { %v1834_v62 = vpop.permute.xlu1 %1833 }
 0x9d8   : > { %v1838_v63 = vsel %vm985_vm4, %v1837_v12, %v1834_v62  ;;  %v341_v62 = vld [vmem:[%s2546_s28] sm:$0xff] }
 0x9d9   : > { %2283 = vmatmul.msk.f32.gmra.mxu2 %vm355_vm1, %v1838_v63  ;;  %1990 = vmatpush.msra.mxu0 %v341_v62  ;;  %v2392_v12 = vld [vmem:[%s300_s11] ss:$0 sm:$0xff] }
 0xa46   : > { %v1875_v4 = vpop.f32.mrf.mxu2 }
 0xa47   : > { %v1876_v3 = vadd.f32 %v1875_v4, %v1839_v1 }
 0xa49   : > { %v1881_v6 = vadd.f32 %v1876_v3, %v2751_v37 }
 0xa4b   : > { %v1883_v8 = vsel %vm355_vm1, %v1881_v6, 0.0 }
 0xa4c   : > { %1884 = vadd.xlane.f32.xlu2 %v1883_v8  ;;  %v1967_v8 = vperm.slane %v2747_v27, 0 }
 0xa5c   : > { %v1878_v9 = vpop.f32.mrf.mxu2 }
 0xa5d   : > { %v1879_v10 = vadd.f32 %v1878_v9, %v1839_v1 }
 0xa5f   : > { %v1882_v13 = vadd.f32 %v1879_v10, %v2761_v57 }
 0xa61   : > { %v1886_v30 = vsel %vm355_vm1, %v1882_v13, 0.0 }
 0xa62   : > { %1887 = vadd.xlane.f32.xlu0 %v1886_v30 }
 0xabf   : > { %v1885_v11 = vpop.xlane.xlu2 %1884 }
 0xac0   : > { %v1889_v49 = vmul.f32 %v1885_v11, %v2727_v2 }
 0xac2   : > { %v1891_v58 = vsub.f32 %v1881_v6, %v1889_v49 }
 0xac4   : > { %v1893_v15 = vmul.f32 %v1891_v58, %v1891_v58 }
 0xac6   : > { %v1895_v37 = vsel %vm355_vm1, %v1893_v15, 0.0 }
 0xac7   : > { %1896 = vadd.xlane.f32.xlu1 %v1895_v37 }
 0xad5   : > { %v1888_v16 = vpop.xlane.xlu0 %1887 }
 0xad6   : > { %v1890_v17 = vmul.f32 %v1888_v16, %v2727_v2 }
 0xad8   : > { %v1892_v18 = vsub.f32 %v1882_v13, %v1890_v17 }
 0xada   : > { %v1894_v19 = vmul.f32 %v1892_v18, %v1892_v18 }
 0xadc   : > { %v1898_v57 = vsel %vm355_vm1, %v1894_v19, 0.0 }
 0xadd   : > { %1899 = vadd.xlane.f32.xlu2 %v1898_v57 }
 0xb3a   : > { %v1897_v24 = vpop.xlane.xlu1 %1896 }
 0xb3b   : > { %v1901_v25 = vmul.f32 %v1897_v24, %v2727_v2 }
 0xb3d   : > { %v1903_v26 = vadd.f32 1e-05, %v1901_v25 }
 0xb3f   : > { %2464 = vrsqrt.f32 %v1903_v26  ;;  %vm1911_vm13 = vweird.f32 %v1903_v26 }
 0xb45   : > { %v2465_v14 = vpop.eup %2464 }
 0xb46   : > { %v1906_v28 = vmul.f32 %v2465_v14, %v1903_v26  ;;  %vm1912_vm12 = vweird.f32 %v2465_v14 }
 0xb47   : > { %vm1913_vm14 = vmor %vm1911_vm13, %vm1912_vm12 }
 0xb48   : > { %v1907_v31 = vmul.f32 %v2465_v14, %v1906_v28 }
 0xb4a   : > { %v1908_v32 = vmul.f32 0.5, %v1907_v31 }
 0xb4c   : > { %v1909_v33 = vsub.f32 1.5, %v1908_v32 }
 0xb4e   : > { %v1910_v34 = vmul.f32 %v2465_v14, %v1909_v33 }
 0xb50   : > { %v1914_v40 = vsel %vm1913_vm14, %v2465_v14, %v1910_v34  ;;  %v1900_v43 = vpop.xlane.xlu2 %1899 }
 0xb51   : > { %v1925_v42 = vmul.f32 %v1914_v40, %v1891_v58  ;;  %v1902_v45 = vmul.f32 %v1900_v43, %v2727_v2 }
 0xb53   : > { %v1928_v36 = vmul.f32 %v1927_v39, %v1925_v42  ;;  %v1904_v47 = vadd.f32 1e-05, %v1902_v45 }
 0xb55   : > { %v1931_v48 = vadd.f32 %v1930_v44, %v1928_v36  ;;  %2466 = vrsqrt.f32 %v1904_v47  ;;  %vm1921_vm0 = vweird.f32 %v1904_v47 }
 0xb57   : > { %2284 = vmatmul.msk.f32.vlgmr.msrb.gmra.mxu3 %vm355_vm1, %v1931_v48 }
 0xb5b   : > { %v2467_v50 = vpop.eup %2466 }
 0xb5c   : > { %v1916_v5 = vmul.f32 %v2467_v50, %v1904_v47  ;;  %vm1922_vm15 = vweird.f32 %v2467_v50 }
 0xb5d   : > { %vm1923_vm2 = vmor %vm1921_vm0, %vm1922_vm15 }
 0xb5e   : > { %v1917_v51 = vmul.f32 %v2467_v50, %v1916_v5 }
 0xb60   : > { %v1918_v52 = vmul.f32 0.5, %v1917_v51 }
 0xb62   : > { %v1919_v53 = vsub.f32 1.5, %v1918_v52 }
 0xb64   : > { %v1920_v54 = vmul.f32 %v2467_v50, %v1919_v53 }
 0xb66   : > { %v1924_v55 = vsel %vm1923_vm2, %v2467_v50, %v1920_v54 }
 0xb67   : > { %v1926_v56 = vmul.f32 %v1924_v55, %v1892_v18 }
 0xb69   : > { %v1929_v59 = vmul.f32 %v1927_v39, %v1926_v56 }
 0xb6b   : > { %v1932_v7 = vadd.f32 %v1930_v44, %v1929_v59 }
 0xb6d   : > { %2285 = vmatmul.msk.f32.gmra.mxu3 %vm355_vm1, %v1932_v7 }
 0xbda   : > { %v1959_v63 = vpop.f32.mrf.mxu3 }
 0xbdb   : > { %v1960_v0 = vadd.f32 %v2392_v12, %v1959_v63 }
 0xbdd   : > { %v1965_v1 = vmax.f32 %v1960_v0, 0.0 }
 0xbdf   : > { %2286 = vmatmul.msk.f32.vlgmr.msra.gmra.mxu0 %vm1968_vm3, %v1965_v1 }
 0xbf0   : > { %v1962_v4 = vpop.f32.mrf.mxu3 }
 0xbf1   : > { %v1963_v3 = vadd.f32 %v2392_v12, %v1962_v4 }
 0xbf3   : > { %v1966_v6 = vmax.f32 %v1963_v3, 0.0 }
 0xbf5   : > { %2287 = vmatmul.msk.f32.gmra.mxu0 %vm1968_vm3, %v1966_v6 }
 0xc5c   : > { %v1992_v9 = vpop.f32.mrf.mxu0 }
 0xc5d   : > { %v1993_v10 = vadd.f32 %v1992_v9, %v1967_v8 }
 0xc5f   : > { %v1998_v13 = vadd.f32 %v1993_v10, %v1931_v48 }
 0xc61   : > { %v2000_v30 = vsel %vm355_vm1, %v1998_v13, 0.0 }
 0xc62   : > { %2001 = vadd.xlane.f32.xlu0 %v2000_v30 }
 0xc72   : > { %v1995_v11 = vpop.f32.mrf.mxu0 }
 0xc73   : > { %v1996_v49 = vadd.f32 %v1995_v11, %v1967_v8  ;;  %v2477_v11 = vld [vmem:[%s2561_s14 + $0x8] sm:$0xff] }
 0xc75   : > { %v1999_v58 = vadd.f32 %v1996_v49, %v1932_v7  ;;  %v2096_v49 = vperm.slane %v2477_v11, 7 }
 0xc77   : > { %v2003_v15 = vsel %vm355_vm1, %v1999_v58, 0.0 }
 0xc78   : > { %2004 = vadd.xlane.f32.xlu1 %v2003_v15  ;;  %v2393_v15 = vld [vmem:[%s2561_s14 + $0x10] ss:$0 sm:$0xff] }
 0xcd5   : > { %v2002_v37 = vpop.xlane.xlu0 %2001 }
 0xcd6   : > { %v2006_v16 = vmul.f32 %v2002_v37, %v2727_v2 }
 0xcd8   : > { %v2008_v17 = vsub.f32 %v1998_v13, %v2006_v16 }
 0xcda   : > { %v2010_v18 = vmul.f32 %v2008_v17, %v2008_v17 }
 0xcdc   : > { %v2012_v19 = vsel %vm355_vm1, %v2010_v18, 0.0 }
 0xcdd   : > { %2013 = vadd.xlane.f32.xlu2 %v2012_v19 }
 0xceb   : > { %v2005_v57 = vpop.xlane.xlu1 %2004 }
 0xcec   : > { %v2007_v21 = vmul.f32 %v2005_v57, %v2727_v2 }
 0xcee   : > { %v2009_v29 = vsub.f32 %v1999_v58, %v2007_v21 }
 0xcf0   : > { %v2011_v22 = vmul.f32 %v2009_v29, %v2009_v29 }
 0xcf2   : > { %v2015_v23 = vsel %vm355_vm1, %v2011_v22, 0.0 }
 0xcf3   : > { %2016 = vadd.xlane.f32.xlu0 %v2015_v23 }
 0xd50   : > { %v2014_v24 = vpop.xlane.xlu2 %2013 }
 0xd51   : > { %v2018_v25 = vmul.f32 %v2014_v24, %v2727_v2 }
 0xd53   : > { %v2020_v26 = vadd.f32 1e-05, %v2018_v25 }
 0xd55   : > { %2468 = vrsqrt.f32 %v2020_v26  ;;  %vm2028_vm5 = vweird.f32 %v2020_v26 }
 0xd5b   : > { %v2469_v14 = vpop.eup %2468 }
 0xd5c   : > { %v2023_v28 = vmul.f32 %v2469_v14, %v2020_v26  ;;  %vm2029_vm4 = vweird.f32 %v2469_v14 }
 0xd5d   : > { %vm2030_vm6 = vmor %vm2028_vm5, %vm2029_vm4 }
 0xd5e   : > { %v2024_v31 = vmul.f32 %v2469_v14, %v2023_v28 }
 0xd60   : > { %v2025_v32 = vmul.f32 0.5, %v2024_v31 }
 0xd62   : > { %v2026_v33 = vsub.f32 1.5, %v2025_v32 }
 0xd64   : > { %v2027_v34 = vmul.f32 %v2469_v14, %v2026_v33 }
 0xd66   : > { %v2031_v38 = vsel %vm2030_vm6, %v2469_v14, %v2027_v34  ;;  %v2017_v39 = vpop.xlane.xlu0 %2016 }
 0xd67   : > { %v2042_v40 = vmul.f32 %v2031_v38, %v2008_v17  ;;  %v2019_v42 = vmul.f32 %v2017_v39, %v2727_v2 }
 0xd69   : > { %v2045_v43 = vmul.f32 %v2044_v35, %v2042_v40  ;;  %v2021_v44 = vadd.f32 1e-05, %v2019_v42 }
 0xd6b   : > { %v2048_v45 = vadd.f32 %v2047_v41, %v2045_v43  ;;  %2470 = vrsqrt.f32 %v2021_v44  ;;  %vm2038_vm8 = vweird.f32 %v2021_v44 }
 0xd6d   : > { %v2052_v46 = vsel %vm355_vm1, %v2048_v45, 0.0  ;;  %2050 = vst.msk [vmem:[#allocation2] sm:$0xff] %vm355_vm1, %v2048_v45 }
 0xd6e   : > { %2053 = vadd.xlane.f32.xlu1 %v2052_v46 }
 0xd71   : > { %v2471_v36 = vpop.eup %2470 }
 0xd72   : > { %v2033_v47 = vmul.f32 %v2471_v36, %v2021_v44  ;;  %vm2039_vm7 = vweird.f32 %v2471_v36 }
 0xd73   : > { %vm2040_vm9 = vmor %vm2038_vm8, %vm2039_vm7 }
 0xd74   : > { %v2034_v20 = vmul.f32 %v2471_v36, %v2033_v47 }
 0xd76   : > { %v2035_v48 = vmul.f32 0.5, %v2034_v20 }
 0xd78   : > { %v2036_v50 = vsub.f32 1.5, %v2035_v48 }
 0xd7a   : > { %v2037_v5 = vmul.f32 %v2471_v36, %v2036_v50 }
 0xd7c   : > { %v2041_v27 = vsel %vm2040_vm9, %v2471_v36, %v2037_v5 }
 0xd7d   : > { %v2043_v51 = vmul.f32 %v2041_v27, %v2009_v29 }
 0xd7f   : > { %v2046_v52 = vmul.f32 %v2044_v35, %v2043_v51 }
 0xd81   : > { %v2049_v53 = vadd.f32 %v2047_v41, %v2046_v52 }
 0xd83   : > { %v2055_v54 = vsel %vm355_vm1, %v2049_v53, 0.0  ;;  %2051 = vst.msk [vmem:[#allocation2 + $0x8] sm:$0xff] %vm355_vm1, %v2049_v53 }
 0xd84   : > { %2056 = vadd.xlane.f32.xlu2 %v2055_v54 }
 0xde1   : > { %v2054_v55 = vpop.xlane.xlu1 %2053 }
 0xde2   : > { %v2058_v56 = vmul.f32 %v2054_v55, %v2727_v2 }
 0xde4   : > { %v2060_v59 = vsub.f32 %v2048_v45, %v2058_v56 }
 0xde6   : > { %v2062_v7 = vmul.f32 %v2060_v59, %v2060_v59 }
 0xde8   : > { %v2064_v60 = vsel %vm355_vm1, %v2062_v7, 0.0 }
 0xde9   : > { %2065 = vadd.xlane.f32.xlu0 %v2064_v60 }
 0xdf7   : > { %v2057_v61 = vpop.xlane.xlu2 %2056 }
 0xdf8   : > { %v2059_v62 = vmul.f32 %v2057_v61, %v2727_v2 }
 0xdfa   : > { %v2061_v12 = vsub.f32 %v2049_v53, %v2059_v62 }
 0xdfc   : > { %v2063_v63 = vmul.f32 %v2061_v12, %v2061_v12 }
 0xdfe   : > { %v2067_v0 = vsel %vm355_vm1, %v2063_v63, 0.0 }
 0xdff   : > { %2068 = vadd.xlane.f32.xlu1 %v2067_v0 }
 0xe5c   : > { %v2066_v1 = vpop.xlane.xlu0 %2065 }
 0xe5d   : > { %v2070_v4 = vmul.f32 %v2066_v1, %v2727_v2 }
 0xe5f   : > { %v2072_v3 = vadd.f32 1e-05, %v2070_v4 }
 0xe61   : > { %2472 = vrsqrt.f32 %v2072_v3  ;;  %vm2080_vm11 = vweird.f32 %v2072_v3 }
 0xe67   : > { %v2473_v6 = vpop.eup %2472 }
 0xe68   : > { %v2075_v8 = vmul.f32 %v2473_v6, %v2072_v3  ;;  %vm2081_vm10 = vweird.f32 %v2473_v6 }
 0xe69   : > { %vm2082_vm12 = vmor %vm2080_vm11, %vm2081_vm10 }
 0xe6a   : > { %v2076_v9 = vmul.f32 %v2473_v6, %v2075_v8 }
 0xe6c   : > { %v2077_v10 = vmul.f32 0.5, %v2076_v9 }
 0xe6e   : > { %v2078_v13 = vsub.f32 1.5, %v2077_v10 }
 0xe70   : > { %v2079_v30 = vmul.f32 %v2473_v6, %v2078_v13 }
 0xe72   : > { %v2083_v58 = vsel %vm2082_vm12, %v2473_v6, %v2079_v30  ;;  %v2069_v16 = vpop.xlane.xlu1 %2068 }
 0xe73   : > { %v2094_v37 = vmul.f32 %v2083_v58, %v2060_v59  ;;  %v2071_v17 = vmul.f32 %v2069_v16, %v2727_v2 }
 0xe75   : > { %v2097_v18 = vmul.f32 %v2096_v49, %v2094_v37  ;;  %v2073_v19 = vadd.f32 1e-05, %v2071_v17 }
 0xe77   : > { %v2100_v57 = vadd.f32 %v2393_v15, %v2097_v18  ;;  %2474 = vrsqrt.f32 %v2073_v19  ;;  %vm2090_vm14 = vweird.f32 %v2073_v19 }
 0xe79   : > { %2102 = vst.msk [vmem:[%s2567_s18] sm:$0xff] %vm355_vm1, %v2100_v57 }
 0xe7d   : > { %v2475_v21 = vpop.eup %2474 }
 0xe7e   : > { %v2085_v29 = vmul.f32 %v2475_v21, %v2073_v19  ;;  %vm2091_vm13 = vweird.f32 %v2475_v21 }
 0xe7f   : > { %vm2092_vm15 = vmor %vm2090_vm14, %vm2091_vm13 }
 0xe80   : > { %v2086_v22 = vmul.f32 %v2475_v21, %v2085_v29 }
 0xe82   : > { %v2087_v23 = vmul.f32 0.5, %v2086_v22 }
 0xe84   : > { %v2088_v24 = vsub.f32 1.5, %v2087_v23 }
 0xe86   : > { %v2089_v25 = vmul.f32 %v2475_v21, %v2088_v24 }
 0xe88   : > { %v2093_v26 = vsel %vm2092_vm15, %v2475_v21, %v2089_v25 }
 0xe89   : > { %v2095_v14 = vmul.f32 %v2093_v26, %v2061_v12 }
 0xe8b   : > { %v2098_v28 = vmul.f32 %v2096_v49, %v2095_v14 }
 0xe8d   : > { %v2101_v2 = vadd.f32 %v2393_v15, %v2098_v28 }
 0xe8f   : > { %2103 = vst.msk [vmem:[%s2567_s18 + $0x8] sm:$0xff] %vm355_vm1, %v2101_v2 }
 0xe90 PF: > { %s16_s21 = sadd.s32 1, %s2484_s21  }
 0xe91   : > { %p13_p5 = scmp.ge.s32.totalorder %s16_s21, 4  }
 0xe93   :  { %15 = sbr.rel (!%p13_p5) target bundleno = 1 (0x1), region = 89 }

</bundles_post_ra>
